<compile_context>
chip_gen: v7x
topology: tpu7x:2x2x1
jax: 0.10.0
libtpu: 0.0.40
codegen_flags: <defaults>
</compile_context>

<pallas_src>
import functools

import jax
import jax.numpy as jnp
import numpy as np
from jax import lax
from jax.experimental import pallas as pl
from jax.experimental.pallas import tpu as pltpu

LN_EPS = 1e-5
INV_SQRT2 = 0.7071067811865476


# ----------------------------- Pallas kernel --------------------------------
def tblock_kernel(
    # inputs
    x_ref, ks_ref, vs_ref, kx_ref, vx_ref,
    n1w_ref, n1b_ref, wq_ref, wo_ref, ab_ref,
    n2w_ref, n2b_ref, wqx_ref, wox_ref, xb_ref,
    n3w_ref, n3b_ref, fc1w_ref, fc1b_ref, fc2w_ref, fc2b_ref,
    # output
    out_ref,
    # scratch
    q_s, ocat_s,
    *, num_heads, head_dim,
):
    f32 = jnp.float32
    bf16 = jnp.bfloat16
    H, D = num_heads, head_dim

    def layernorm(h, w_ref, b_ref):
        # single-pass LN (E[x^2] - mu^2) in f32; one lane-reduction pass
        mu = jnp.mean(h, axis=-1, keepdims=True)
        ms = jnp.mean(h * h, axis=-1, keepdims=True)
        var = ms - mu * mu
        return (h - mu) * lax.rsqrt(var + LN_EPS) * w_ref[...] + b_ref[...]

    def project_q(h_bf, wq_r):
        # one fused lane-dense projection: (TQ, C) @ (C, H*D); scale folded into the weight.
        qf = jnp.dot(h_bf, wq_r[...], preferred_element_type=f32)
        for h in range(H):                       # static head-split into (H, TQ, D) scratch
            q_s[h] = qf[:, h * D:(h + 1) * D].astype(bf16)

    def attention(k3, v3, wo_r, b_r):
        # q_s: (H, TQ, D); k3/v3: (H, M, D); all bf16, heads on the leading (batch) axis
        q3 = q_s[...]
        s = jnp.einsum('hqd,hkd->hqk', q3, k3, preferred_element_type=f32)
        m = jnp.max(s, axis=-1, keepdims=True)
        e = jnp.exp(s - m)
        p = e * pl.reciprocal(jnp.sum(e, axis=-1, keepdims=True), approx=True)
        o3 = jnp.einsum('hqk,hkd->hqd', p.astype(bf16), v3, preferred_element_type=f32)
        # concat heads on the lane axis (bf16 scratch), then ONE full-width output projection:
        # the head-sum happens inside the MXU contraction over C = H*D.
        for h in range(H):
            ocat_s[:, h * D:(h + 1) * D] = o3[h].astype(bf16)
        return jnp.dot(ocat_s[...], wo_r[...], preferred_element_type=f32) + b_r[...]

    x_t = x_ref[...]                             # (TQ, C) f32 query tile

    # ---- self-attention branch (K/V pre-projected in the wrapper from LN1(x)) ----
    h1 = layernorm(x_t, n1w_ref, n1b_ref).astype(bf16)
    project_q(h1, wq_ref)
    x_t = x_t + attention(ks_ref[...], vs_ref[...], wo_ref, ab_ref)

    # ---- cross-attention branch (K/V pre-projected from the raw context) ----
    h2 = layernorm(x_t, n2w_ref, n2b_ref).astype(bf16)
    project_q(h2, wqx_ref)
    x_t = x_t + attention(kx_ref[...], vx_ref[...], wox_ref, xb_ref)

    # ---- MLP branch (exact erf GELU, matching nn.GELU default; tanh would move it to EUP) ----
    h3 = layernorm(x_t, n3w_ref, n3b_ref).astype(bf16)
    hm = jnp.dot(h3, fc1w_ref[...], preferred_element_type=f32) + fc1b_ref[...]
    hm = 0.5 * hm * (1.0 + lax.erf(hm * INV_SQRT2))
    ho = jnp.dot(hm.astype(bf16), fc2w_ref[...], preferred_element_type=f32) + fc2b_ref[...]

    out_ref[...] = (x_t + ho).astype(out_ref.dtype)


# --------------------------- parameter packing -------------------------------
def pack_params(p, num_heads):
    """Transpose weights to (in, out), fold the attention scale into the Q weights,
    and cast matmul weights to bf16.  Output-channel layout stays h*D + d, so head
    slices / head concatenation use static lane slices."""
    C = p["attn_proj_w"].shape[0]
    H = num_heads
    D = C // H
    scale = D ** -0.5
    bf = jnp.bfloat16
    f32 = jnp.float32
    qkv = p["qkv_w"]
    kv = p["kv_w"]
    return {
        "n1_w": p["n1_w"][None].astype(f32), "n1_b": p["n1_b"][None].astype(f32),
        "wq": (qkv[:C].T * scale).astype(bf),            # (C, H*D), scale folded
        "wk": qkv[C:2 * C].T.astype(bf),                 # used by the wrapper projection
        "wv": qkv[2 * C:].T.astype(bf),
        "wo": p["attn_proj_w"].T.astype(bf),             # (C, C)
        "attn_proj_b": p["attn_proj_b"][None].astype(f32),
        "n2_w": p["n2_w"][None].astype(f32), "n2_b": p["n2_b"][None].astype(f32),
        "wqx": (p["q_w"].T * scale).astype(bf),
        "wkx": kv[:C].T.astype(bf),                      # (Cc, C), wrapper projection
        "wvx": kv[C:].T.astype(bf),
        "wox": p["xproj_w"].T.astype(bf),
        "xproj_b": p["xproj_b"][None].astype(f32),
        "n3_w": p["n3_w"][None].astype(f32), "n3_b": p["n3_b"][None].astype(f32),
        "fc1_w": p["fc1_w"].T.astype(bf), "fc1_b": p["fc1_b"][None].astype(f32),
        "fc2_w": p["fc2_w"].T.astype(bf), "fc2_b": p["fc2_b"][None].astype(f32),
    }


def _ln(h, w, b):
    mu = h.mean(-1, keepdims=True)
    var = ((h - mu) ** 2).mean(-1, keepdims=True)
    return (h - mu) / jnp.sqrt(var + LN_EPS) * w + b


def _vmem_limit_bytes():
    # generation-aware: ~96 MiB on 128 MiB parts (v5e/v6e), ~48 MiB on v7x (64 MiB).
    try:
        cap = pltpu.get_tpu_info().vmem_capacity_bytes
    except Exception:
        cap = 64 * 1024 * 1024
    return int(min(cap * 3 // 4, 100 * 1024 * 1024))


# ------------------------------ wrapper --------------------------------------
def tblock_forward(x, context, params, num_heads, *, tq=None):
    B, N, C = x.shape
    _, CN, Cc = context.shape
    H = num_heads
    assert C % H == 0
    D = C // H
    hidden = params["fc1_w"].shape[0]
    if tq is None:
        tq = min(N, 256)
    assert N % tq == 0, "token tile must divide N"
    T = N // tq

    pk = pack_params(params, H)
    f32, bf16 = jnp.float32, jnp.bfloat16

    # ---- hoisted K/V projections: full-MXU-shape XLA matmuls, head-leading bf16 layout ----
    def heads_leading(y):  # (B, M, H*D) -> (B, H, M, D)
        Bm, M, _ = y.shape
        return jnp.transpose(y.reshape(Bm, M, H, D), (0, 2, 1, 3))

    xn1 = _ln(x, params["n1_w"], params["n1_b"]).astype(bf16)   # LN1(x) for self-attn K/V
    ctx_bf = context.astype(bf16)                               # cross-attn K/V uses raw context
    ks = heads_leading(jnp.dot(xn1, pk["wk"], preferred_element_type=f32)).astype(bf16)
    vs = heads_leading(jnp.dot(xn1, pk["wv"], preferred_element_type=f32)).astype(bf16)
    kx = heads_leading(jnp.dot(ctx_bf, pk["wkx"], preferred_element_type=f32)).astype(bf16)
    vx = heads_leading(jnp.dot(ctx_bf, pk["wvx"], preferred_element_type=f32)).astype(bf16)

    kernel = functools.partial(tblock_kernel, num_heads=H, head_dim=D)

    def wspec(shape):  # whole-array (weight) block, constant across the grid
        return pl.BlockSpec(shape, lambda *_: (0,) * len(shape))

    in_specs = [
        pl.BlockSpec((None, tq, C), lambda b, t: (b, t, 0)),       # x query tile
        pl.BlockSpec((None, H, N, D), lambda b, t: (b, 0, 0, 0)),  # self-attn K
        pl.BlockSpec((None, H, N, D), lambda b, t: (b, 0, 0, 0)),  # self-attn V
        pl.BlockSpec((None, H, CN, D), lambda b, t: (b, 0, 0, 0)), # cross-attn K
        pl.BlockSpec((None, H, CN, D), lambda b, t: (b, 0, 0, 0)), # cross-attn V
        wspec((1, C)), wspec((1, C)),                              # norm1 w, b
        wspec((C, C)), wspec((C, C)), wspec((1, C)),               # wq (fused), wo, proj bias
        wspec((1, C)), wspec((1, C)),                              # norm2 w, b
        wspec((C, C)), wspec((C, C)), wspec((1, C)),               # wqx (fused), wox, bias
        wspec((1, C)), wspec((1, C)),                              # norm3 w, b
        wspec((C, hidden)), wspec((1, hidden)),                    # fc1 W^T, b
        wspec((hidden, C)), wspec((1, C)),                         # fc2 W^T, b
    ]
    scratch = [
        pltpu.VMEM((H, tq, D), bf16),   # Q heads (reused for self / cross)
        pltpu.VMEM((tq, C), bf16),      # concatenated head outputs (lane-dense proj input)
    ]

    return pl.pallas_call(
        kernel,
        out_shape=jax.ShapeDtypeStruct((B, N, C), jnp.float32),  # bf16 here would halve writeback
        grid=(B, T),
        in_specs=in_specs,
        out_specs=pl.BlockSpec((None, tq, C), lambda b, t: (b, t, 0)),
        scratch_shapes=scratch,
        compiler_params=pltpu.CompilerParams(
            # no scratch carry across grid steps anymore -> both axes parallel
            # (keeps both v7x TensorCores busy even when B == 1).
            dimension_semantics=("parallel", "parallel"),
            vmem_limit_bytes=_vmem_limit_bytes(),
        ),
    )(
        x, ks, vs, kx, vx,
        pk["n1_w"], pk["n1_b"], pk["wq"], pk["wo"], pk["attn_proj_b"],
        pk["n2_w"], pk["n2_b"], pk["wqx"], pk["wox"], pk["xproj_b"],
        pk["n3_w"], pk["n3_b"], pk["fc1_w"], pk["fc1_b"], pk["fc2_w"], pk["fc2_b"],
    )


# ------------------------- pure-JAX reference --------------------------------
def _attn_ref(x, ctx, p, H, cross):
    B, N, C = x.shape
    Dh = C // H
    scale = Dh ** -0.5
    if not cross:
        qkv = (x @ p["qkv_w"].T).reshape(B, N, 3, H, Dh).transpose(2, 0, 3, 1, 4)
        q, k, v = qkv[0], qkv[1], qkv[2]
        proj_w, proj_b = p["attn_proj_w"], p["attn_proj_b"]
    else:
        CN = ctx.shape[1]
        kv = (ctx @ p["kv_w"].T).reshape(B, CN, 2, H, Dh).transpose(2, 0, 3, 1, 4)
        q = (x @ p["q_w"].T).reshape(B, N, H, Dh).transpose(0, 2, 1, 3)
        k, v = kv[0], kv[1]
        proj_w, proj_b = p["xproj_w"], p["xproj_b"]
    q = q * scale
    a = jax.nn.softmax(q @ jnp.swapaxes(k, -2, -1), axis=-1)
    o = (a @ v).transpose(0, 2, 1, 3).reshape(B, N, C)
    return o @ proj_w.T + proj_b


def tblock_reference(x, ctx, p, H):
    x = x + _attn_ref(_ln(x, p["n1_w"], p["n1_b"]), None, p, H, cross=False)
    x = x + _attn_ref(_ln(x, p["n2_w"], p["n2_b"]), ctx, p, H, cross=True)
    h = _ln(x, p["n3_w"], p["n3_b"])
    h = h @ p["fc1_w"].T + p["fc1_b"]
    h = 0.5 * h * (1.0 + lax.erf(h * INV_SQRT2))
    h = h @ p["fc2_w"].T + p["fc2_b"]
    return x + h


# --------------------------------- main ---------------------------------------
if __name__ == "__main__":
    B, N, C = 2, 16, 64
    CN, Cc = 8, 32
    num_heads = 4
    hidden = int(C * 4.0)
    TQ = 8   # grid = (B, N // TQ) = (2, 2)

    key = jax.random.PRNGKey(0)
    ks = jax.random.split(key, 24)

    def w(k, out_f, in_f, s=0.05):
        return jax.random.normal(k, (out_f, in_f), jnp.float32) * s

    def b(k, n, s=0.02):
        return jax.random.normal(k, (n,), jnp.float32) * s

    params = {
        "n1_w": 1.0 + 0.1 * jax.random.normal(ks[0], (C,), jnp.float32),
        "n1_b": b(ks[1], C),
        "qkv_w": w(ks[2], 3 * C, C),                 # qkv_bias=False
        "attn_proj_w": w(ks[3], C, C),
        "attn_proj_b": b(ks[4], C),
        "n2_w": 1.0 + 0.1 * jax.random.normal(ks[5], (C,), jnp.float32),
        "n2_b": b(ks[6], C),
        "q_w": w(ks[7], C, C),                       # qkv_bias=False
        "kv_w": w(ks[8], 2 * C, Cc),                 # qkv_bias=False
        "xproj_w": w(ks[9], C, C),
        "xproj_b": b(ks[10], C),
        "n3_w": 1.0 + 0.1 * jax.random.normal(ks[11], (C,), jnp.float32),
        "n3_b": b(ks[12], C),
        "fc1_w": w(ks[13], hidden, C),
        "fc1_b": b(ks[14], hidden),
        "fc2_w": w(ks[15], C, hidden),
        "fc2_b": b(ks[16], C),
    }

    x = jax.random.normal(ks[20], (B, N, C), jnp.float32)
    context = jax.random.normal(ks[21], (B, CN, Cc), jnp.float32)

    out = tblock_forward(x, context, params, num_heads, tq=TQ)
    out = jax.block_until_ready(out)

    ref = tblock_reference(x, context, params, num_heads)
    # bf16 MXU operands + approx reciprocal => relaxed tolerance vs pure-f32 reference
    np.testing.assert_allclose(np.asarray(out), np.asarray(ref), rtol=2e-2, atol=2e-2)

    print("KERNEL_OK")
</pallas_src>

<mosaic_0001>
module attributes {stable_mosaic.version = 11 : i64} {
  func.func @tblock_kernel(%arg0: i32, %arg1: i32, %arg2: memref<1x8x64xf32, #tpu.memory_space<vmem>>, %arg3: memref<1x4x16x16xbf16, #tpu.memory_space<vmem>>, %arg4: memref<1x4x16x16xbf16, #tpu.memory_space<vmem>>, %arg5: memref<1x4x8x16xbf16, #tpu.memory_space<vmem>>, %arg6: memref<1x4x8x16xbf16, #tpu.memory_space<vmem>>, %arg7: memref<1x64xf32, #tpu.memory_space<vmem>>, %arg8: memref<1x64xf32, #tpu.memory_space<vmem>>, %arg9: memref<64x64xbf16, #tpu.memory_space<vmem>>, %arg10: memref<64x64xbf16, #tpu.memory_space<vmem>>, %arg11: memref<1x64xf32, #tpu.memory_space<vmem>>, %arg12: memref<1x64xf32, #tpu.memory_space<vmem>>, %arg13: memref<1x64xf32, #tpu.memory_space<vmem>>, %arg14: memref<64x64xbf16, #tpu.memory_space<vmem>>, %arg15: memref<64x64xbf16, #tpu.memory_space<vmem>>, %arg16: memref<1x64xf32, #tpu.memory_space<vmem>>, %arg17: memref<1x64xf32, #tpu.memory_space<vmem>>, %arg18: memref<1x64xf32, #tpu.memory_space<vmem>>, %arg19: memref<64x256xbf16, #tpu.memory_space<vmem>>, %arg20: memref<1x256xf32, #tpu.memory_space<vmem>>, %arg21: memref<256x64xbf16, #tpu.memory_space<vmem>>, %arg22: memref<1x64xf32, #tpu.memory_space<vmem>>, %arg23: memref<1x8x64xf32, #tpu.memory_space<vmem>>, %arg24: memref<4x8x16xbf16, #tpu.memory_space<vmem>>, %arg25: memref<8x64xbf16, #tpu.memory_space<vmem>>) attributes {dimension_semantics = [#tpu.dimension_semantics<parallel>, #tpu.dimension_semantics<parallel>], iteration_bounds = array<i64: 2, 2>, scalar_prefetch = 0 : i64, scratch_operands = 2 : i64, tpu.core_type = #tpu.core_type<tc>, window_params = [{transform_indices = @transform_0, window_bounds = array<i64: 1, 8, 64>}, {transform_indices = @transform_1, window_bounds = array<i64: 1, 4, 16, 16>}, {transform_indices = @transform_2, window_bounds = array<i64: 1, 4, 16, 16>}, {transform_indices = @transform_3, window_bounds = array<i64: 1, 4, 8, 16>}, {transform_indices = @transform_4, window_bounds = array<i64: 1, 4, 8, 16>}, {pipeline_mode = #tpu.pipeline_mode<synchronous>, transform_indices = @transform_5, window_bounds = array<i64: 1, 64>}, {pipeline_mode = #tpu.pipeline_mode<synchronous>, transform_indices = @transform_6, window_bounds = array<i64: 1, 64>}, {pipeline_mode = #tpu.pipeline_mode<synchronous>, transform_indices = @transform_7, window_bounds = array<i64: 64, 64>}, {pipeline_mode = #tpu.pipeline_mode<synchronous>, transform_indices = @transform_8, window_bounds = array<i64: 64, 64>}, {pipeline_mode = #tpu.pipeline_mode<synchronous>, transform_indices = @transform_9, window_bounds = array<i64: 1, 64>}, {pipeline_mode = #tpu.pipeline_mode<synchronous>, transform_indices = @transform_10, window_bounds = array<i64: 1, 64>}, {pipeline_mode = #tpu.pipeline_mode<synchronous>, transform_indices = @transform_11, window_bounds = array<i64: 1, 64>}, {pipeline_mode = #tpu.pipeline_mode<synchronous>, transform_indices = @transform_12, window_bounds = array<i64: 64, 64>}, {pipeline_mode = #tpu.pipeline_mode<synchronous>, transform_indices = @transform_13, window_bounds = array<i64: 64, 64>}, {pipeline_mode = #tpu.pipeline_mode<synchronous>, transform_indices = @transform_14, window_bounds = array<i64: 1, 64>}, {pipeline_mode = #tpu.pipeline_mode<synchronous>, transform_indices = @transform_15, window_bounds = array<i64: 1, 64>}, {pipeline_mode = #tpu.pipeline_mode<synchronous>, transform_indices = @transform_16, window_bounds = array<i64: 1, 64>}, {pipeline_mode = #tpu.pipeline_mode<synchronous>, transform_indices = @transform_17, window_bounds = array<i64: 64, 256>}, {pipeline_mode = #tpu.pipeline_mode<synchronous>, transform_indices = @transform_18, window_bounds = array<i64: 1, 256>}, {pipeline_mode = #tpu.pipeline_mode<synchronous>, transform_indices = @transform_19, window_bounds = array<i64: 256, 64>}, {pipeline_mode = #tpu.pipeline_mode<synchronous>, transform_indices = @transform_20, window_bounds = array<i64: 1, 64>}, {transform_indices = @transform_21, window_bounds = array<i64: 1, 8, 64>}]} {
    %c0 = arith.constant 0 : index
    %c0_0 = arith.constant 0 : index
    %c0_1 = arith.constant 0 : index
    %0 = vector.load %arg2[%c0, %c0_0, %c0_1] : memref<1x8x64xf32, #tpu.memory_space<vmem>>, vector<1x8x64xf32>
    %1 = vector.shape_cast %0 : vector<1x8x64xf32> to vector<8x64xf32>
    %cst = arith.constant dense<0.000000e+00> : vector<8xf32>
    %2 = vector.multi_reduction <add>, %1, %cst [1] : vector<8x64xf32> to vector<8xf32>
    %3 = vector.shape_cast %2 : vector<8xf32> to vector<8x1xf32>
    %cst_2 = arith.constant 6.400000e+01 : f32
    %4 = vector.broadcast %cst_2 : f32 to vector<8x1xf32>
    %5 = arith.divf %3, %4 : vector<8x1xf32>
    %6 = arith.mulf %1, %1 : vector<8x64xf32>
    %cst_3 = arith.constant dense<0.000000e+00> : vector<8xf32>
    %7 = vector.multi_reduction <add>, %6, %cst_3 [1] : vector<8x64xf32> to vector<8xf32>
    %8 = vector.shape_cast %7 : vector<8xf32> to vector<8x1xf32>
    %cst_4 = arith.constant 6.400000e+01 : f32
    %9 = vector.broadcast %cst_4 : f32 to vector<8x1xf32>
    %10 = arith.divf %8, %9 : vector<8x1xf32>
    %11 = arith.mulf %5, %5 : vector<8x1xf32>
    %12 = arith.subf %10, %11 : vector<8x1xf32>
    %13 = vector.broadcast %5 : vector<8x1xf32> to vector<8x64xf32>
    %14 = arith.subf %1, %13 : vector<8x64xf32>
    %cst_5 = arith.constant 9.99999974E-6 : f32
    %15 = vector.broadcast %cst_5 : f32 to vector<8x1xf32>
    %16 = arith.addf %12, %15 : vector<8x1xf32>
    %17 = math.rsqrt %16 : vector<8x1xf32>
    %18 = vector.broadcast %17 : vector<8x1xf32> to vector<8x64xf32>
    %19 = arith.mulf %14, %18 : vector<8x64xf32>
    %c0_6 = arith.constant 0 : index
    %c0_7 = arith.constant 0 : index
    %20 = vector.load %arg7[%c0_6, %c0_7] : memref<1x64xf32, #tpu.memory_space<vmem>>, vector<1x64xf32>
    %21 = vector.broadcast %20 : vector<1x64xf32> to vector<8x64xf32>
    %22 = arith.mulf %19, %21 : vector<8x64xf32>
    %c0_8 = arith.constant 0 : index
    %c0_9 = arith.constant 0 : index
    %23 = vector.load %arg8[%c0_8, %c0_9] : memref<1x64xf32, #tpu.memory_space<vmem>>, vector<1x64xf32>
    %24 = vector.broadcast %23 : vector<1x64xf32> to vector<8x64xf32>
    %25 = arith.addf %22, %24 : vector<8x64xf32>
    %26 = arith.truncf %25 : vector<8x64xf32> to vector<8x64xbf16>
    %c0_10 = arith.constant 0 : index
    %c0_11 = arith.constant 0 : index
    %27 = vector.load %arg9[%c0_10, %c0_11] : memref<64x64xbf16, #tpu.memory_space<vmem>>, vector<64x64xbf16>
    %cst_12 = arith.constant dense<0.000000e+00> : vector<8x64xf32>
    %28 = tpu.matmul %26, %27, %cst_12 {dimension_numbers = #tpu.dot_dimension_numbers<[1], [0], [0], [1], [0, 0, 1, 1], [], []>} : vector<8x64xbf16>, vector<64x64xbf16>, vector<8x64xf32> -> vector<8x64xf32>
    %29 = vector.extract_strided_slice %28 {offsets = [0, 0], sizes = [8, 16], strides = [1, 1]} : vector<8x64xf32> to vector<8x16xf32>
    %30 = arith.truncf %29 : vector<8x16xf32> to vector<8x16xbf16>
    %c0_13 = arith.constant 0 : index
    %c0_14 = arith.constant 0 : index
    %c0_15 = arith.constant 0 : index
    %31 = vector.load %arg24[%c0_13, %c0_14, %c0_15] : memref<4x8x16xbf16, #tpu.memory_space<vmem>>, vector<1x8x16xbf16>
    %32 = vector.shape_cast %31 : vector<1x8x16xbf16> to vector<8x16xbf16>
    %33 = vector.shape_cast %30 : vector<8x16xbf16> to vector<1x8x16xbf16>
    tpu.vector_store %arg24[%c0_13, %c0_14, %c0_15], %33 {strides = array<i32>} : memref<4x8x16xbf16, #tpu.memory_space<vmem>>, vector<1x8x16xbf16>,
    %34 = vector.extract_strided_slice %28 {offsets = [0, 16], sizes = [8, 16], strides = [1, 1]} : vector<8x64xf32> to vector<8x16xf32>
    %35 = arith.truncf %34 : vector<8x16xf32> to vector<8x16xbf16>
    %c1 = arith.constant 1 : index
    %c0_16 = arith.constant 0 : index
    %c0_17 = arith.constant 0 : index
    %36 = vector.load %arg24[%c1, %c0_16, %c0_17] : memref<4x8x16xbf16, #tpu.memory_space<vmem>>, vector<1x8x16xbf16>
    %37 = vector.shape_cast %36 : vector<1x8x16xbf16> to vector<8x16xbf16>
    %38 = vector.shape_cast %35 : vector<8x16xbf16> to vector<1x8x16xbf16>
    tpu.vector_store %arg24[%c1, %c0_16, %c0_17], %38 {strides = array<i32>} : memref<4x8x16xbf16, #tpu.memory_space<vmem>>, vector<1x8x16xbf16>,
    %39 = vector.extract_strided_slice %28 {offsets = [0, 32], sizes = [8, 16], strides = [1, 1]} : vector<8x64xf32> to vector<8x16xf32>
    %40 = arith.truncf %39 : vector<8x16xf32> to vector<8x16xbf16>
    %c2 = arith.constant 2 : index
    %c0_18 = arith.constant 0 : index
    %c0_19 = arith.constant 0 : index
    %41 = vector.load %arg24[%c2, %c0_18, %c0_19] : memref<4x8x16xbf16, #tpu.memory_space<vmem>>, vector<1x8x16xbf16>
    %42 = vector.shape_cast %41 : vector<1x8x16xbf16> to vector<8x16xbf16>
    %43 = vector.shape_cast %40 : vector<8x16xbf16> to vector<1x8x16xbf16>
    tpu.vector_store %arg24[%c2, %c0_18, %c0_19], %43 {strides = array<i32>} : memref<4x8x16xbf16, #tpu.memory_space<vmem>>, vector<1x8x16xbf16>,
    %44 = vector.extract_strided_slice %28 {offsets = [0, 48], sizes = [8, 16], strides = [1, 1]} : vector<8x64xf32> to vector<8x16xf32>
    %45 = arith.truncf %44 : vector<8x16xf32> to vector<8x16xbf16>
    %c3 = arith.constant 3 : index
    %c0_20 = arith.constant 0 : index
    %c0_21 = arith.constant 0 : index
    %46 = vector.load %arg24[%c3, %c0_20, %c0_21] : memref<4x8x16xbf16, #tpu.memory_space<vmem>>, vector<1x8x16xbf16>
    %47 = vector.shape_cast %46 : vector<1x8x16xbf16> to vector<8x16xbf16>
    %48 = vector.shape_cast %45 : vector<8x16xbf16> to vector<1x8x16xbf16>
    tpu.vector_store %arg24[%c3, %c0_20, %c0_21], %48 {strides = array<i32>} : memref<4x8x16xbf16, #tpu.memory_space<vmem>>, vector<1x8x16xbf16>,
    %c0_22 = arith.constant 0 : index
    %c0_23 = arith.constant 0 : index
    %c0_24 = arith.constant 0 : index
    %c0_25 = arith.constant 0 : index
    %49 = vector.load %arg3[%c0_22, %c0_23, %c0_24, %c0_25] : memref<1x4x16x16xbf16, #tpu.memory_space<vmem>>, vector<1x4x16x16xbf16>
    %50 = vector.shape_cast %49 : vector<1x4x16x16xbf16> to vector<4x16x16xbf16>
    %c0_26 = arith.constant 0 : index
    %c0_27 = arith.constant 0 : index
    %c0_28 = arith.constant 0 : index
    %c0_29 = arith.constant 0 : index
    %51 = vector.load %arg4[%c0_26, %c0_27, %c0_28, %c0_29] : memref<1x4x16x16xbf16, #tpu.memory_space<vmem>>, vector<1x4x16x16xbf16>
    %52 = vector.shape_cast %51 : vector<1x4x16x16xbf16> to vector<4x16x16xbf16>
    %c0_30 = arith.constant 0 : index
    %c0_31 = arith.constant 0 : index
    %c0_32 = arith.constant 0 : index
    %53 = vector.load %arg24[%c0_30, %c0_31, %c0_32] : memref<4x8x16xbf16, #tpu.memory_space<vmem>>, vector<4x8x16xbf16>
    "tpu.trace_start"() <{level = 10 : i32, message = "hqd,hkd->hqk"}> : () -> ()
    %cst_33 = arith.constant dense<0.000000e+00> : vector<4x8x16xf32>
    %54 = tpu.matmul %53, %50, %cst_33 {dimension_numbers = #tpu.dot_dimension_numbers<[2], [2], [1], [1], [0, 0, 0, 1, 1, 1], [0], [0]>} : vector<4x8x16xbf16>, vector<4x16x16xbf16>, vector<4x8x16xf32> -> vector<4x8x16xf32>
    "tpu.trace_stop"() : () -> ()
    %cst_34 = arith.constant dense<0xFF800000> : vector<4x8xf32>
    %55 = vector.multi_reduction <maximumf>, %54, %cst_34 [2] : vector<4x8x16xf32> to vector<4x8xf32>
    %56 = vector.shape_cast %55 : vector<4x8xf32> to vector<4x8x1xf32>
    %57 = vector.broadcast %56 : vector<4x8x1xf32> to vector<4x8x16xf32>
    %58 = arith.subf %54, %57 : vector<4x8x16xf32>
    %59 = math.exp %58 : vector<4x8x16xf32>
    %cst_35 = arith.constant dense<0.000000e+00> : vector<4x8xf32>
    %60 = vector.multi_reduction <add>, %59, %cst_35 [2] : vector<4x8x16xf32> to vector<4x8xf32>
    %61 = vector.shape_cast %60 : vector<4x8xf32> to vector<4x8x1xf32>
    %62 = tpu.reciprocal %61 {approx = true} : vector<4x8x1xf32> -> vector<4x8x1xf32>
    %63 = vector.broadcast %62 : vector<4x8x1xf32> to vector<4x8x16xf32>
    %64 = arith.mulf %59, %63 : vector<4x8x16xf32>
    %65 = arith.truncf %64 : vector<4x8x16xf32> to vector<4x8x16xbf16>
    "tpu.trace_start"() <{level = 10 : i32, message = "hqk,hkd->hqd"}> : () -> ()
    %cst_36 = arith.constant dense<0.000000e+00> : vector<4x8x16xf32>
    %66 = tpu.matmul %65, %52, %cst_36 {dimension_numbers = #tpu.dot_dimension_numbers<[2], [1], [1], [2], [0, 0, 0, 1, 1, 2], [0], [0]>} : vector<4x8x16xbf16>, vector<4x16x16xbf16>, vector<4x8x16xf32> -> vector<4x8x16xf32>
    "tpu.trace_stop"() : () -> ()
    %67 = vector.extract_strided_slice %66 {offsets = [0, 0, 0], sizes = [1, 8, 16], strides = [1, 1, 1]} : vector<4x8x16xf32> to vector<1x8x16xf32>
    %68 = vector.shape_cast %67 : vector<1x8x16xf32> to vector<8x16xf32>
    %69 = arith.truncf %68 : vector<8x16xf32> to vector<8x16xbf16>
    %c0_37 = arith.constant 0 : index
    %c0_38 = arith.constant 0 : index
    %70 = vector.load %arg25[%c0_37, %c0_38] : memref<8x64xbf16, #tpu.memory_space<vmem>>, vector<8x16xbf16>
    tpu.vector_store %arg25[%c0_37, %c0_38], %69 {strides = array<i32>} : memref<8x64xbf16, #tpu.memory_space<vmem>>, vector<8x16xbf16>,
    %71 = vector.extract_strided_slice %66 {offsets = [1, 0, 0], sizes = [1, 8, 16], strides = [1, 1, 1]} : vector<4x8x16xf32> to vector<1x8x16xf32>
    %72 = vector.shape_cast %71 : vector<1x8x16xf32> to vector<8x16xf32>
    %73 = arith.truncf %72 : vector<8x16xf32> to vector<8x16xbf16>
    %c0_39 = arith.constant 0 : index
    %c16 = arith.constant 16 : index
    %74 = vector.load %arg25[%c0_39, %c16] : memref<8x64xbf16, #tpu.memory_space<vmem>>, vector<8x16xbf16>
    tpu.vector_store %arg25[%c0_39, %c16], %73 {strides = array<i32>} : memref<8x64xbf16, #tpu.memory_space<vmem>>, vector<8x16xbf16>,
    %75 = vector.extract_strided_slice %66 {offsets = [2, 0, 0], sizes = [1, 8, 16], strides = [1, 1, 1]} : vector<4x8x16xf32> to vector<1x8x16xf32>
    %76 = vector.shape_cast %75 : vector<1x8x16xf32> to vector<8x16xf32>
    %77 = arith.truncf %76 : vector<8x16xf32> to vector<8x16xbf16>
    %c0_40 = arith.constant 0 : index
    %c32 = arith.constant 32 : index
    %78 = vector.load %arg25[%c0_40, %c32] : memref<8x64xbf16, #tpu.memory_space<vmem>>, vector<8x16xbf16>
    tpu.vector_store %arg25[%c0_40, %c32], %77 {strides = array<i32>} : memref<8x64xbf16, #tpu.memory_space<vmem>>, vector<8x16xbf16>,
    %79 = vector.extract_strided_slice %66 {offsets = [3, 0, 0], sizes = [1, 8, 16], strides = [1, 1, 1]} : vector<4x8x16xf32> to vector<1x8x16xf32>
    %80 = vector.shape_cast %79 : vector<1x8x16xf32> to vector<8x16xf32>
    %81 = arith.truncf %80 : vector<8x16xf32> to vector<8x16xbf16>
    %c0_41 = arith.constant 0 : index
    %c48 = arith.constant 48 : index
    %82 = vector.load %arg25[%c0_41, %c48] : memref<8x64xbf16, #tpu.memory_space<vmem>>, vector<8x16xbf16>
    tpu.vector_store %arg25[%c0_41, %c48], %81 {strides = array<i32>} : memref<8x64xbf16, #tpu.memory_space<vmem>>, vector<8x16xbf16>,
    %c0_42 = arith.constant 0 : index
    %c0_43 = arith.constant 0 : index
    %83 = vector.load %arg25[%c0_42, %c0_43] : memref<8x64xbf16, #tpu.memory_space<vmem>>, vector<8x64xbf16>
    %c0_44 = arith.constant 0 : index
    %c0_45 = arith.constant 0 : index
    %84 = vector.load %arg10[%c0_44, %c0_45] : memref<64x64xbf16, #tpu.memory_space<vmem>>, vector<64x64xbf16>
    %cst_46 = arith.constant dense<0.000000e+00> : vector<8x64xf32>
    %85 = tpu.matmul %83, %84, %cst_46 {dimension_numbers = #tpu.dot_dimension_numbers<[1], [0], [0], [1], [0, 0, 1, 1], [], []>} : vector<8x64xbf16>, vector<64x64xbf16>, vector<8x64xf32> -> vector<8x64xf32>
    %c0_47 = arith.constant 0 : index
    %c0_48 = arith.constant 0 : index
    %86 = vector.load %arg11[%c0_47, %c0_48] : memref<1x64xf32, #tpu.memory_space<vmem>>, vector<1x64xf32>
    %87 = vector.broadcast %86 : vector<1x64xf32> to vector<8x64xf32>
    %88 = arith.addf %85, %87 : vector<8x64xf32>
    %89 = arith.addf %1, %88 : vector<8x64xf32>
    %cst_49 = arith.constant dense<0.000000e+00> : vector<8xf32>
    %90 = vector.multi_reduction <add>, %89, %cst_49 [1] : vector<8x64xf32> to vector<8xf32>
    %91 = vector.shape_cast %90 : vector<8xf32> to vector<8x1xf32>
    %cst_50 = arith.constant 6.400000e+01 : f32
    %92 = vector.broadcast %cst_50 : f32 to vector<8x1xf32>
    %93 = arith.divf %91, %92 : vector<8x1xf32>
    %94 = arith.mulf %89, %89 : vector<8x64xf32>
    %cst_51 = arith.constant dense<0.000000e+00> : vector<8xf32>
    %95 = vector.multi_reduction <add>, %94, %cst_51 [1] : vector<8x64xf32> to vector<8xf32>
    %96 = vector.shape_cast %95 : vector<8xf32> to vector<8x1xf32>
    %cst_52 = arith.constant 6.400000e+01 : f32
    %97 = vector.broadcast %cst_52 : f32 to vector<8x1xf32>
    %98 = arith.divf %96, %97 : vector<8x1xf32>
    %99 = arith.mulf %93, %93 : vector<8x1xf32>
    %100 = arith.subf %98, %99 : vector<8x1xf32>
    %101 = vector.broadcast %93 : vector<8x1xf32> to vector<8x64xf32>
    %102 = arith.subf %89, %101 : vector<8x64xf32>
    %cst_53 = arith.constant 9.99999974E-6 : f32
    %103 = vector.broadcast %cst_53 : f32 to vector<8x1xf32>
    %104 = arith.addf %100, %103 : vector<8x1xf32>
    %105 = math.rsqrt %104 : vector<8x1xf32>
    %106 = vector.broadcast %105 : vector<8x1xf32> to vector<8x64xf32>
    %107 = arith.mulf %102, %106 : vector<8x64xf32>
    %c0_54 = arith.constant 0 : index
    %c0_55 = arith.constant 0 : index
    %108 = vector.load %arg12[%c0_54, %c0_55] : memref<1x64xf32, #tpu.memory_space<vmem>>, vector<1x64xf32>
    %109 = vector.broadcast %108 : vector<1x64xf32> to vector<8x64xf32>
    %110 = arith.mulf %107, %109 : vector<8x64xf32>
    %c0_56 = arith.constant 0 : index
    %c0_57 = arith.constant 0 : index
    %111 = vector.load %arg13[%c0_56, %c0_57] : memref<1x64xf32, #tpu.memory_space<vmem>>, vector<1x64xf32>
    %112 = vector.broadcast %111 : vector<1x64xf32> to vector<8x64xf32>
    %113 = arith.addf %110, %112 : vector<8x64xf32>
    %114 = arith.truncf %113 : vector<8x64xf32> to vector<8x64xbf16>
    %c0_58 = arith.constant 0 : index
    %c0_59 = arith.constant 0 : index
    %115 = vector.load %arg14[%c0_58, %c0_59] : memref<64x64xbf16, #tpu.memory_space<vmem>>, vector<64x64xbf16>
    %cst_60 = arith.constant dense<0.000000e+00> : vector<8x64xf32>
    %116 = tpu.matmul %114, %115, %cst_60 {dimension_numbers = #tpu.dot_dimension_numbers<[1], [0], [0], [1], [0, 0, 1, 1], [], []>} : vector<8x64xbf16>, vector<64x64xbf16>, vector<8x64xf32> -> vector<8x64xf32>
    %117 = vector.extract_strided_slice %116 {offsets = [0, 0], sizes = [8, 16], strides = [1, 1]} : vector<8x64xf32> to vector<8x16xf32>
    %118 = arith.truncf %117 : vector<8x16xf32> to vector<8x16xbf16>
    %c0_61 = arith.constant 0 : index
    %c0_62 = arith.constant 0 : index
    %c0_63 = arith.constant 0 : index
    %119 = vector.load %arg24[%c0_61, %c0_62, %c0_63] : memref<4x8x16xbf16, #tpu.memory_space<vmem>>, vector<1x8x16xbf16>
    %120 = vector.shape_cast %119 : vector<1x8x16xbf16> to vector<8x16xbf16>
    %121 = vector.shape_cast %118 : vector<8x16xbf16> to vector<1x8x16xbf16>
    tpu.vector_store %arg24[%c0_61, %c0_62, %c0_63], %121 {strides = array<i32>} : memref<4x8x16xbf16, #tpu.memory_space<vmem>>, vector<1x8x16xbf16>,
    %122 = vector.extract_strided_slice %116 {offsets = [0, 16], sizes = [8, 16], strides = [1, 1]} : vector<8x64xf32> to vector<8x16xf32>
    %123 = arith.truncf %122 : vector<8x16xf32> to vector<8x16xbf16>
    %c1_64 = arith.constant 1 : index
    %c0_65 = arith.constant 0 : index
    %c0_66 = arith.constant 0 : index
    %124 = vector.load %arg24[%c1_64, %c0_65, %c0_66] : memref<4x8x16xbf16, #tpu.memory_space<vmem>>, vector<1x8x16xbf16>
    %125 = vector.shape_cast %124 : vector<1x8x16xbf16> to vector<8x16xbf16>
    %126 = vector.shape_cast %123 : vector<8x16xbf16> to vector<1x8x16xbf16>
    tpu.vector_store %arg24[%c1_64, %c0_65, %c0_66], %126 {strides = array<i32>} : memref<4x8x16xbf16, #tpu.memory_space<vmem>>, vector<1x8x16xbf16>,
    %127 = vector.extract_strided_slice %116 {offsets = [0, 32], sizes = [8, 16], strides = [1, 1]} : vector<8x64xf32> to vector<8x16xf32>
    %128 = arith.truncf %127 : vector<8x16xf32> to vector<8x16xbf16>
    %c2_67 = arith.constant 2 : index
    %c0_68 = arith.constant 0 : index
    %c0_69 = arith.constant 0 : index
    %129 = vector.load %arg24[%c2_67, %c0_68, %c0_69] : memref<4x8x16xbf16, #tpu.memory_space<vmem>>, vector<1x8x16xbf16>
    %130 = vector.shape_cast %129 : vector<1x8x16xbf16> to vector<8x16xbf16>
    %131 = vector.shape_cast %128 : vector<8x16xbf16> to vector<1x8x16xbf16>
    tpu.vector_store %arg24[%c2_67, %c0_68, %c0_69], %131 {strides = array<i32>} : memref<4x8x16xbf16, #tpu.memory_space<vmem>>, vector<1x8x16xbf16>,
    %132 = vector.extract_strided_slice %116 {offsets = [0, 48], sizes = [8, 16], strides = [1, 1]} : vector<8x64xf32> to vector<8x16xf32>
    %133 = arith.truncf %132 : vector<8x16xf32> to vector<8x16xbf16>
    %c3_70 = arith.constant 3 : index
    %c0_71 = arith.constant 0 : index
    %c0_72 = arith.constant 0 : index
    %134 = vector.load %arg24[%c3_70, %c0_71, %c0_72] : memref<4x8x16xbf16, #tpu.memory_space<vmem>>, vector<1x8x16xbf16>
    %135 = vector.shape_cast %134 : vector<1x8x16xbf16> to vector<8x16xbf16>
    %136 = vector.shape_cast %133 : vector<8x16xbf16> to vector<1x8x16xbf16>
    tpu.vector_store %arg24[%c3_70, %c0_71, %c0_72], %136 {strides = array<i32>} : memref<4x8x16xbf16, #tpu.memory_space<vmem>>, vector<1x8x16xbf16>,
    %c0_73 = arith.constant 0 : index
    %c0_74 = arith.constant 0 : index
    %c0_75 = arith.constant 0 : index
    %c0_76 = arith.constant 0 : index
    %137 = vector.load %arg5[%c0_73, %c0_74, %c0_75, %c0_76] : memref<1x4x8x16xbf16, #tpu.memory_space<vmem>>, vector<1x4x8x16xbf16>
    %138 = vector.shape_cast %137 : vector<1x4x8x16xbf16> to vector<4x8x16xbf16>
    %c0_77 = arith.constant 0 : index
    %c0_78 = arith.constant 0 : index
    %c0_79 = arith.constant 0 : index
    %c0_80 = arith.constant 0 : index
    %139 = vector.load %arg6[%c0_77, %c0_78, %c0_79, %c0_80] : memref<1x4x8x16xbf16, #tpu.memory_space<vmem>>, vector<1x4x8x16xbf16>
    %140 = vector.shape_cast %139 : vector<1x4x8x16xbf16> to vector<4x8x16xbf16>
    %c0_81 = arith.constant 0 : index
    %c0_82 = arith.constant 0 : index
    %c0_83 = arith.constant 0 : index
    %141 = vector.load %arg24[%c0_81, %c0_82, %c0_83] : memref<4x8x16xbf16, #tpu.memory_space<vmem>>, vector<4x8x16xbf16>
    "tpu.trace_start"() <{level = 10 : i32, message = "hqd,hkd->hqk"}> : () -> ()
    %cst_84 = arith.constant dense<0.000000e+00> : vector<4x8x8xf32>
    %142 = tpu.matmul %141, %138, %cst_84 {dimension_numbers = #tpu.dot_dimension_numbers<[2], [2], [1], [1], [0, 0, 0, 1, 1, 1], [0], [0]>} : vector<4x8x16xbf16>, vector<4x8x16xbf16>, vector<4x8x8xf32> -> vector<4x8x8xf32>
    "tpu.trace_stop"() : () -> ()
    %cst_85 = arith.constant dense<0xFF800000> : vector<4x8xf32>
    %143 = vector.multi_reduction <maximumf>, %142, %cst_85 [2] : vector<4x8x8xf32> to vector<4x8xf32>
    %144 = vector.shape_cast %143 : vector<4x8xf32> to vector<4x8x1xf32>
    %145 = vector.broadcast %144 : vector<4x8x1xf32> to vector<4x8x8xf32>
    %146 = arith.subf %142, %145 : vector<4x8x8xf32>
    %147 = math.exp %146 : vector<4x8x8xf32>
    %cst_86 = arith.constant dense<0.000000e+00> : vector<4x8xf32>
    %148 = vector.multi_reduction <add>, %147, %cst_86 [2] : vector<4x8x8xf32> to vector<4x8xf32>
    %149 = vector.shape_cast %148 : vector<4x8xf32> to vector<4x8x1xf32>
    %150 = tpu.reciprocal %149 {approx = true} : vector<4x8x1xf32> -> vector<4x8x1xf32>
    %151 = vector.broadcast %150 : vector<4x8x1xf32> to vector<4x8x8xf32>
    %152 = arith.mulf %147, %151 : vector<4x8x8xf32>
    %153 = arith.truncf %152 : vector<4x8x8xf32> to vector<4x8x8xbf16>
    "tpu.trace_start"() <{level = 10 : i32, message = "hqk,hkd->hqd"}> : () -> ()
    %cst_87 = arith.constant dense<0.000000e+00> : vector<4x8x16xf32>
    %154 = tpu.matmul %153, %140, %cst_87 {dimension_numbers = #tpu.dot_dimension_numbers<[2], [1], [1], [2], [0, 0, 0, 1, 1, 2], [0], [0]>} : vector<4x8x8xbf16>, vector<4x8x16xbf16>, vector<4x8x16xf32> -> vector<4x8x16xf32>
    "tpu.trace_stop"() : () -> ()
    %155 = vector.extract_strided_slice %154 {offsets = [0, 0, 0], sizes = [1, 8, 16], strides = [1, 1, 1]} : vector<4x8x16xf32> to vector<1x8x16xf32>
    %156 = vector.shape_cast %155 : vector<1x8x16xf32> to vector<8x16xf32>
    %157 = arith.truncf %156 : vector<8x16xf32> to vector<8x16xbf16>
    %c0_88 = arith.constant 0 : index
    %c0_89 = arith.constant 0 : index
    %158 = vector.load %arg25[%c0_88, %c0_89] : memref<8x64xbf16, #tpu.memory_space<vmem>>, vector<8x16xbf16>
    tpu.vector_store %arg25[%c0_88, %c0_89], %157 {strides = array<i32>} : memref<8x64xbf16, #tpu.memory_space<vmem>>, vector<8x16xbf16>,
    %159 = vector.extract_strided_slice %154 {offsets = [1, 0, 0], sizes = [1, 8, 16], strides = [1, 1, 1]} : vector<4x8x16xf32> to vector<1x8x16xf32>
    %160 = vector.shape_cast %159 : vector<1x8x16xf32> to vector<8x16xf32>
    %161 = arith.truncf %160 : vector<8x16xf32> to vector<8x16xbf16>
    %c0_90 = arith.constant 0 : index
    %c16_91 = arith.constant 16 : index
    %162 = vector.load %arg25[%c0_90, %c16_91] : memref<8x64xbf16, #tpu.memory_space<vmem>>, vector<8x16xbf16>
    tpu.vector_store %arg25[%c0_90, %c16_91], %161 {strides = array<i32>} : memref<8x64xbf16, #tpu.memory_space<vmem>>, vector<8x16xbf16>,
    %163 = vector.extract_strided_slice %154 {offsets = [2, 0, 0], sizes = [1, 8, 16], strides = [1, 1, 1]} : vector<4x8x16xf32> to vector<1x8x16xf32>
    %164 = vector.shape_cast %163 : vector<1x8x16xf32> to vector<8x16xf32>
    %165 = arith.truncf %164 : vector<8x16xf32> to vector<8x16xbf16>
    %c0_92 = arith.constant 0 : index
    %c32_93 = arith.constant 32 : index
    %166 = vector.load %arg25[%c0_92, %c32_93] : memref<8x64xbf16, #tpu.memory_space<vmem>>, vector<8x16xbf16>
    tpu.vector_store %arg25[%c0_92, %c32_93], %165 {strides = array<i32>} : memref<8x64xbf16, #tpu.memory_space<vmem>>, vector<8x16xbf16>,
    %167 = vector.extract_strided_slice %154 {offsets = [3, 0, 0], sizes = [1, 8, 16], strides = [1, 1, 1]} : vector<4x8x16xf32> to vector<1x8x16xf32>
    %168 = vector.shape_cast %167 : vector<1x8x16xf32> to vector<8x16xf32>
    %169 = arith.truncf %168 : vector<8x16xf32> to vector<8x16xbf16>
    %c0_94 = arith.constant 0 : index
    %c48_95 = arith.constant 48 : index
    %170 = vector.load %arg25[%c0_94, %c48_95] : memref<8x64xbf16, #tpu.memory_space<vmem>>, vector<8x16xbf16>
    tpu.vector_store %arg25[%c0_94, %c48_95], %169 {strides = array<i32>} : memref<8x64xbf16, #tpu.memory_space<vmem>>, vector<8x16xbf16>,
    %c0_96 = arith.constant 0 : index
    %c0_97 = arith.constant 0 : index
    %171 = vector.load %arg25[%c0_96, %c0_97] : memref<8x64xbf16, #tpu.memory_space<vmem>>, vector<8x64xbf16>
    %c0_98 = arith.constant 0 : index
    %c0_99 = arith.constant 0 : index
    %172 = vector.load %arg15[%c0_98, %c0_99] : memref<64x64xbf16, #tpu.memory_space<vmem>>, vector<64x64xbf16>
    %cst_100 = arith.constant dense<0.000000e+00> : vector<8x64xf32>
    %173 = tpu.matmul %171, %172, %cst_100 {dimension_numbers = #tpu.dot_dimension_numbers<[1], [0], [0], [1], [0, 0, 1, 1], [], []>} : vector<8x64xbf16>, vector<64x64xbf16>, vector<8x64xf32> -> vector<8x64xf32>
    %c0_101 = arith.constant 0 : index
    %c0_102 = arith.constant 0 : index
    %174 = vector.load %arg16[%c0_101, %c0_102] : memref<1x64xf32, #tpu.memory_space<vmem>>, vector<1x64xf32>
    %175 = vector.broadcast %174 : vector<1x64xf32> to vector<8x64xf32>
    %176 = arith.addf %173, %175 : vector<8x64xf32>
    %177 = arith.addf %89, %176 : vector<8x64xf32>
    %cst_103 = arith.constant dense<0.000000e+00> : vector<8xf32>
    %178 = vector.multi_reduction <add>, %177, %cst_103 [1] : vector<8x64xf32> to vector<8xf32>
    %179 = vector.shape_cast %178 : vector<8xf32> to vector<8x1xf32>
    %cst_104 = arith.constant 6.400000e+01 : f32
    %180 = vector.broadcast %cst_104 : f32 to vector<8x1xf32>
    %181 = arith.divf %179, %180 : vector<8x1xf32>
    %182 = arith.mulf %177, %177 : vector<8x64xf32>
    %cst_105 = arith.constant dense<0.000000e+00> : vector<8xf32>
    %183 = vector.multi_reduction <add>, %182, %cst_105 [1] : vector<8x64xf32> to vector<8xf32>
    %184 = vector.shape_cast %183 : vector<8xf32> to vector<8x1xf32>
    %cst_106 = arith.constant 6.400000e+01 : f32
    %185 = vector.broadcast %cst_106 : f32 to vector<8x1xf32>
    %186 = arith.divf %184, %185 : vector<8x1xf32>
    %187 = arith.mulf %181, %181 : vector<8x1xf32>
    %188 = arith.subf %186, %187 : vector<8x1xf32>
    %189 = vector.broadcast %181 : vector<8x1xf32> to vector<8x64xf32>
    %190 = arith.subf %177, %189 : vector<8x64xf32>
    %cst_107 = arith.constant 9.99999974E-6 : f32
    %191 = vector.broadcast %cst_107 : f32 to vector<8x1xf32>
    %192 = arith.addf %188, %191 : vector<8x1xf32>
    %193 = math.rsqrt %192 : vector<8x1xf32>
    %194 = vector.broadcast %193 : vector<8x1xf32> to vector<8x64xf32>
    %195 = arith.mulf %190, %194 : vector<8x64xf32>
    %c0_108 = arith.constant 0 : index
    %c0_109 = arith.constant 0 : index
    %196 = vector.load %arg17[%c0_108, %c0_109] : memref<1x64xf32, #tpu.memory_space<vmem>>, vector<1x64xf32>
    %197 = vector.broadcast %196 : vector<1x64xf32> to vector<8x64xf32>
    %198 = arith.mulf %195, %197 : vector<8x64xf32>
    %c0_110 = arith.constant 0 : index
    %c0_111 = arith.constant 0 : index
    %199 = vector.load %arg18[%c0_110, %c0_111] : memref<1x64xf32, #tpu.memory_space<vmem>>, vector<1x64xf32>
    %200 = vector.broadcast %199 : vector<1x64xf32> to vector<8x64xf32>
    %201 = arith.addf %198, %200 : vector<8x64xf32>
    %202 = arith.truncf %201 : vector<8x64xf32> to vector<8x64xbf16>
    %c0_112 = arith.constant 0 : index
    %c0_113 = arith.constant 0 : index
    %203 = vector.load %arg19[%c0_112, %c0_113] : memref<64x256xbf16, #tpu.memory_space<vmem>>, vector<64x256xbf16>
    %cst_114 = arith.constant dense<0.000000e+00> : vector<8x256xf32>
    %204 = tpu.matmul %202, %203, %cst_114 {dimension_numbers = #tpu.dot_dimension_numbers<[1], [0], [0], [1], [0, 0, 1, 1], [], []>} : vector<8x64xbf16>, vector<64x256xbf16>, vector<8x256xf32> -> vector<8x256xf32>
    %c0_115 = arith.constant 0 : index
    %c0_116 = arith.constant 0 : index
    %205 = vector.load %arg20[%c0_115, %c0_116] : memref<1x256xf32, #tpu.memory_space<vmem>>, vector<1x256xf32>
    %206 = vector.broadcast %205 : vector<1x256xf32> to vector<8x256xf32>
    %207 = arith.addf %204, %206 : vector<8x256xf32>
    %cst_117 = arith.constant 5.000000e-01 : f32
    %208 = vector.broadcast %cst_117 : f32 to vector<8x256xf32>
    %209 = arith.mulf %208, %207 : vector<8x256xf32>
    %cst_118 = arith.constant 0.707106769 : f32
    %210 = vector.broadcast %cst_118 : f32 to vector<8x256xf32>
    %211 = arith.mulf %207, %210 : vector<8x256xf32>
    %212 = math.erf %211 : vector<8x256xf32>
    %cst_119 = arith.constant 1.000000e+00 : f32
    %213 = vector.broadcast %cst_119 : f32 to vector<8x256xf32>
    %214 = arith.addf %213, %212 : vector<8x256xf32>
    %215 = arith.mulf %209, %214 : vector<8x256xf32>
    %216 = arith.truncf %215 : vector<8x256xf32> to vector<8x256xbf16>
    %c0_120 = arith.constant 0 : index
    %c0_121 = arith.constant 0 : index
    %217 = vector.load %arg21[%c0_120, %c0_121] : memref<256x64xbf16, #tpu.memory_space<vmem>>, vector<256x64xbf16>
    %cst_122 = arith.constant dense<0.000000e+00> : vector<8x64xf32>
    %218 = tpu.matmul %216, %217, %cst_122 {dimension_numbers = #tpu.dot_dimension_numbers<[1], [0], [0], [1], [0, 0, 1, 1], [], []>} : vector<8x256xbf16>, vector<256x64xbf16>, vector<8x64xf32> -> vector<8x64xf32>
    %c0_123 = arith.constant 0 : index
    %c0_124 = arith.constant 0 : index
    %219 = vector.load %arg22[%c0_123, %c0_124] : memref<1x64xf32, #tpu.memory_space<vmem>>, vector<1x64xf32>
    %220 = vector.broadcast %219 : vector<1x64xf32> to vector<8x64xf32>
    %221 = arith.addf %218, %220 : vector<8x64xf32>
    %222 = arith.addf %177, %221 : vector<8x64xf32>
    %c0_125 = arith.constant 0 : index
    %c0_126 = arith.constant 0 : index
    %c0_127 = arith.constant 0 : index
    %223 = vector.load %arg23[%c0_125, %c0_126, %c0_127] : memref<1x8x64xf32, #tpu.memory_space<vmem>>, vector<1x8x64xf32>
    %224 = vector.shape_cast %223 : vector<1x8x64xf32> to vector<8x64xf32>
    %225 = vector.shape_cast %222 : vector<8x64xf32> to vector<1x8x64xf32>
    tpu.vector_store %arg23[%c0_125, %c0_126, %c0_127], %225 {strides = array<i32>} : memref<1x8x64xf32, #tpu.memory_space<vmem>>, vector<1x8x64xf32>,
    return
  }
  func.func @transform_0(%arg0: i32, %arg1: i32) -> (i32, i32, i32) {
    %c0_i32 = arith.constant 0 : i32
    %c0_i32_0 = arith.constant 0 : i32
    return %arg0, %arg1, %c0_i32 : i32, i32, i32
  }
  func.func @transform_1(%arg0: i32, %arg1: i32) -> (i32, i32, i32, i32) {
    %c0_i32 = arith.constant 0 : i32
    %c0_i32_0 = arith.constant 0 : i32
    %c0_i32_1 = arith.constant 0 : i32
    %c0_i32_2 = arith.constant 0 : i32
    return %arg0, %c0_i32, %c0_i32_0, %c0_i32_1 : i32, i32, i32, i32
  }
  func.func @transform_2(%arg0: i32, %arg1: i32) -> (i32, i32, i32, i32) {
    %c0_i32 = arith.constant 0 : i32
    %c0_i32_0 = arith.constant 0 : i32
    %c0_i32_1 = arith.constant 0 : i32
    %c0_i32_2 = arith.constant 0 : i32
    return %arg0, %c0_i32, %c0_i32_0, %c0_i32_1 : i32, i32, i32, i32
  }
  func.func @transform_3(%arg0: i32, %arg1: i32) -> (i32, i32, i32, i32) {
    %c0_i32 = arith.constant 0 : i32
    %c0_i32_0 = arith.constant 0 : i32
    %c0_i32_1 = arith.constant 0 : i32
    %c0_i32_2 = arith.constant 0 : i32
    return %arg0, %c0_i32, %c0_i32_0, %c0_i32_1 : i32, i32, i32, i32
  }
  func.func @transform_4(%arg0: i32, %arg1: i32) -> (i32, i32, i32, i32) {
    %c0_i32 = arith.constant 0 : i32
    %c0_i32_0 = arith.constant 0 : i32
    %c0_i32_1 = arith.constant 0 : i32
    %c0_i32_2 = arith.constant 0 : i32
    return %arg0, %c0_i32, %c0_i32_0, %c0_i32_1 : i32, i32, i32, i32
  }
  func.func @transform_5(%arg0: i32, %arg1: i32) -> (i32, i32) {
    %c0_i32 = arith.constant 0 : i32
    %c0_i32_0 = arith.constant 0 : i32
    %c0_i32_1 = arith.constant 0 : i32
    return %c0_i32, %c0_i32_0 : i32, i32
  }
  func.func @transform_6(%arg0: i32, %arg1: i32) -> (i32, i32) {
    %c0_i32 = arith.constant 0 : i32
    %c0_i32_0 = arith.constant 0 : i32
    %c0_i32_1 = arith.constant 0 : i32
    return %c0_i32, %c0_i32_0 : i32, i32
  }
  func.func @transform_7(%arg0: i32, %arg1: i32) -> (i32, i32) {
    %c0_i32 = arith.constant 0 : i32
    %c0_i32_0 = arith.constant 0 : i32
    %c0_i32_1 = arith.constant 0 : i32
    return %c0_i32, %c0_i32_0 : i32, i32
  }
  func.func @transform_8(%arg0: i32, %arg1: i32) -> (i32, i32) {
    %c0_i32 = arith.constant 0 : i32
    %c0_i32_0 = arith.constant 0 : i32
    %c0_i32_1 = arith.constant 0 : i32
    return %c0_i32, %c0_i32_0 : i32, i32
  }
  func.func @transform_9(%arg0: i32, %arg1: i32) -> (i32, i32) {
    %c0_i32 = arith.constant 0 : i32
    %c0_i32_0 = arith.constant 0 : i32
    %c0_i32_1 = arith.constant 0 : i32
    return %c0_i32, %c0_i32_0 : i32, i32
  }
  func.func @transform_10(%arg0: i32, %arg1: i32) -> (i32, i32) {
    %c0_i32 = arith.constant 0 : i32
    %c0_i32_0 = arith.constant 0 : i32
    %c0_i32_1 = arith.constant 0 : i32
    return %c0_i32, %c0_i32_0 : i32, i32
  }
  func.func @transform_11(%arg0: i32, %arg1: i32) -> (i32, i32) {
    %c0_i32 = arith.constant 0 : i32
    %c0_i32_0 = arith.constant 0 : i32
    %c0_i32_1 = arith.constant 0 : i32
    return %c0_i32, %c0_i32_0 : i32, i32
  }
  func.func @transform_12(%arg0: i32, %arg1: i32) -> (i32, i32) {
    %c0_i32 = arith.constant 0 : i32
    %c0_i32_0 = arith.constant 0 : i32
    %c0_i32_1 = arith.constant 0 : i32
    return %c0_i32, %c0_i32_0 : i32, i32
  }
  func.func @transform_13(%arg0: i32, %arg1: i32) -> (i32, i32) {
    %c0_i32 = arith.constant 0 : i32
    %c0_i32_0 = arith.constant 0 : i32
    %c0_i32_1 = arith.constant 0 : i32
    return %c0_i32, %c0_i32_0 : i32, i32
  }
  func.func @transform_14(%arg0: i32, %arg1: i32) -> (i32, i32) {
    %c0_i32 = arith.constant 0 : i32
    %c0_i32_0 = arith.constant 0 : i32
    %c0_i32_1 = arith.constant 0 : i32
    return %c0_i32, %c0_i32_0 : i32, i32
  }
  func.func @transform_15(%arg0: i32, %arg1: i32) -> (i32, i32) {
    %c0_i32 = arith.constant 0 : i32
    %c0_i32_0 = arith.constant 0 : i32
    %c0_i32_1 = arith.constant 0 : i32
    return %c0_i32, %c0_i32_0 : i32, i32
  }
  func.func @transform_16(%arg0: i32, %arg1: i32) -> (i32, i32) {
    %c0_i32 = arith.constant 0 : i32
    %c0_i32_0 = arith.constant 0 : i32
    %c0_i32_1 = arith.constant 0 : i32
    return %c0_i32, %c0_i32_0 : i32, i32
  }
  func.func @transform_17(%arg0: i32, %arg1: i32) -> (i32, i32) {
    %c0_i32 = arith.constant 0 : i32
    %c0_i32_0 = arith.constant 0 : i32
    %c0_i32_1 = arith.constant 0 : i32
    return %c0_i32, %c0_i32_0 : i32, i32
  }
  func.func @transform_18(%arg0: i32, %arg1: i32) -> (i32, i32) {
    %c0_i32 = arith.constant 0 : i32
    %c0_i32_0 = arith.constant 0 : i32
    %c0_i32_1 = arith.constant 0 : i32
    return %c0_i32, %c0_i32_0 : i32, i32
  }
  func.func @transform_19(%arg0: i32, %arg1: i32) -> (i32, i32) {
    %c0_i32 = arith.constant 0 : i32
    %c0_i32_0 = arith.constant 0 : i32
    %c0_i32_1 = arith.constant 0 : i32
    return %c0_i32, %c0_i32_0 : i32, i32
  }
  func.func @transform_20(%arg0: i32, %arg1: i32) -> (i32, i32) {
    %c0_i32 = arith.constant 0 : i32
    %c0_i32_0 = arith.constant 0 : i32
    %c0_i32_1 = arith.constant 0 : i32
    return %c0_i32, %c0_i32_0 : i32, i32
  }
  func.func @transform_21(%arg0: i32, %arg1: i32) -> (i32, i32, i32) {
    %c0_i32 = arith.constant 0 : i32
    %c0_i32_0 = arith.constant 0 : i32
    return %arg0, %arg1, %c0_i32 : i32, i32, i32
  }
}

</mosaic_0001>

<bundles_post_ra>
// kernel: tpu_custom_call.1
= control target key start
LH: loop header
LB: loop body
LE: loop exit
PB: predicated region body
PF: predicated region fallthrough
CT: control target
= control target key end

     0   :  { %s4894_s0 = inlined_call_operand.hbm [shape: f32[2,16,64], index: 0, kind: input, shape index: {}]   ;;  %s4895_s1 = inlined_call_operand.vmem [shape: bf16[2,4,16,16], index: 1, kind: input, shape index: {}]   ;;  %s4896_s2 = inlined_call_operand.vmem [shape: bf16[2,4,16,16], index: 2, kind: input, shape index: {}]   ;;  %s4897_s3 = inlined_call_operand.hbm [shape: bf16[2,4,8,16], index: 3, kind: input, shape index: {}]   ;;  %s4898_s4 = inlined_call_operand.hbm [shape: bf16[2,4,8,16], index: 4, kind: input, shape index: {}]   ;;  %s4899_s5 = inlined_call_operand.vmem [shape: f32[1,64], index: 5, kind: input, shape index: {}]   ;;  %s4900_s6 = inlined_call_operand.vmem [shape: f32[1,64], index: 6, kind: input, shape index: {}]   ;;  %s4901_s7 = inlined_call_operand.hbm [shape: bf16[64,64], index: 7, kind: input, shape index: {}]   ;;  %s4902_s8 = inlined_call_operand.hbm [shape: bf16[64,64], index: 8, kind: input, shape index: {}]   ;;  %s4903_s9 = inlined_call_operand.vmem [shape: f32[1,64], index: 9, kind: input, shape index: {}]   ;;  %s4904_s10 = inlined_call_operand.vmem [shape: f32[1,64], index: 10, kind: input, shape index: {}]   ;;  %s4905_s11 = inlined_call_operand.vmem [shape: f32[1,64], index: 11, kind: input, shape index: {}]   ;;  %s4906_s12 = inlined_call_operand.hbm [shape: bf16[64,64], index: 12, kind: input, shape index: {}]   ;;  %s4907_s13 = inlined_call_operand.hbm [shape: bf16[64,64], index: 13, kind: input, shape index: {}]   ;;  %s4908_s14 = inlined_call_operand.hbm [shape: f32[1,64], index: 14, kind: input, shape index: {}]   ;;  %s4909_s15 = inlined_call_operand.hbm [shape: f32[1,64], index: 15, kind: input, shape index: {}]   ;;  %s4910_s16 = inlined_call_operand.hbm [shape: f32[1,64], index: 16, kind: input, shape index: {}]   ;;  %s4911_s17 = inlined_call_operand.vmem [shape: bf16[64,256], index: 17, kind: input, shape index: {}]   ;;  %s4912_s18 = inlined_call_operand.vmem [shape: f32[1,256], index: 18, kind: input, shape index: {}]   ;;  %s4913_s19 = inlined_call_operand.vmem [shape: bf16[256,64], index: 19, kind: input, shape index: {}]   ;;  %s4914_s20 = inlined_call_operand.vmem [shape: f32[1,64], index: 20, kind: input, shape index: {}]   ;;  %s4915_s21 = inlined_call_operand.hbm [shape: f32[2,16,64], index: 21, kind: output, shape index: {}]  }
   0x1   :  { %4950 = sst [smem:[#allocation38_spill]] %s4894_s0 }
   0x2   :  { %4951 = sst [smem:[#allocation39_spill]] %s4895_s1 }
   0x3   :  { %4952 = sst [smem:[#allocation40_spill]] %s4896_s2 }
   0x4   :  { %4953 = sst [smem:[#allocation41_spill]] %s4897_s3 }
   0x5   :  { %4954 = sst [smem:[#allocation42_spill]] %s4898_s4 }
   0x6   :  { %4955 = sst [smem:[#allocation43_spill]] %s4899_s5 }
   0x7   :  { %4956 = sst [smem:[#allocation44_spill]] %s4900_s6 }
   0x8   :  { %4957 = sst [smem:[#allocation45_spill]] %s4901_s7 }
   0x9   :  { %4958 = sst [smem:[#allocation46_spill]] %s4902_s8 }
   0xa   :  { %4959 = sst [smem:[#allocation47_spill]] %s4903_s9 }
   0xb   :  { %4960 = sst [smem:[#allocation48_spill]] %s4904_s10 }
   0xc   :  { %4961 = sst [smem:[#allocation49_spill]] %s4905_s11 }
   0xd   :  { %4962 = sst [smem:[#allocation50_spill]] %s4906_s12 }
   0xe   :  { %4963 = sst [smem:[#allocation51_spill]] %s4907_s13 }
   0xf   :  { %4964 = sst [smem:[#allocation52_spill]] %s4908_s14 }
  0x10   :  { %4965 = sst [smem:[#allocation53_spill]] %s4909_s15 }
  0x11   :  { %4966 = sst [smem:[#allocation54_spill]] %s4910_s16 }
  0x12   :  { %4967 = sst [smem:[#allocation55_spill]] %s4911_s17 }
  0x13   :  { %4968 = sst [smem:[#allocation56_spill]] %s4912_s18 }
  0x14   :  { %4969 = sst [smem:[#allocation57_spill]] %s4913_s19 }
  0x15   :  { %4970 = sst [smem:[#allocation58_spill]] %s4914_s20 }
  0x16   :  { %4971 = sst [smem:[#allocation59_spill]] %s4915_s21 }
  0x17   :  { %26 = vsyncpa [#allocation5], 0 }
  0x18   :  { %28 = vsyncpa [#allocation5 + $0x1], 0 }
  0x19   :  { %29 = vsyncpa [#allocation8], 0 }
  0x1a   :  { %31 = vsyncpa [#allocation8 + $0x1], 0 }
  0x1b   :  { %32 = vsyncpa [#allocation11], 0 }
  0x1c   :  { %33 = vsyncpa [#allocation14], 0 }
  0x1d   :  { %34 = vsyncpa [#allocation17], 0 }
  0x1e   :  { %35 = vsyncpa [#allocation20], 0 }
  0x1f   :  { %36 = vsyncpa [#allocation6], 0 }
  0x20   :  { %38 = vsyncpa [#allocation6 + $0x1], 0  ;;  %s4048_s2 = smov 0   ;;  %s4050_s25 = smov 0  }
  0x21   :  { %s4052_s26 = smov 0   ;;  %s4054_s27 = smov 0  }
  0x22   :  { %s4056_s3 = smov 0   ;;  %s4058_s28 = smov 0  }
  0x23   :  { %s4060_s29 = smov 0   ;;  %s4062_s0 = smov 0  }
  0x24   :  { %s4064_s4 = smov 0   ;;  %s4066_s30 = smov 0  }
  0x25   :  { %s4068_s5 = smov 0  }
  0x26 LB: > { %4972 = sst [smem:[#allocation29_spill]] %s3878_s25  ;;  %s4104_s22 = sadd.s32 4294967295, %s3914_s5   ;;  %s3914_s5 = sphi %s4068_s5, %s44_s5   ;;  %s3910_s30 = sphi %s4066_s30, %s5056_s30   ;;  %s3906_s4 = sphi %s4064_s4, %s5055_s4   ;;  %s3902_s0 = sphi %s4062_s0, %s5054_s0   ;;  %s3898_s29 = sphi %s4060_s29, %s5053_s29   ;;  %s3894_s28 = sphi %s4058_s28, %s5052_s28   ;;  %s3890_s3 = sphi %s4056_s3, %s5051_s3   ;;  %s3886_s27 = sphi %s4054_s27, %s5048_s27   ;;  %s3882_s26 = sphi %s4052_s26, %s5050_s26   ;;  %s3878_s25 = sphi %s4050_s25, %s5049_s25   ;;  %s3874_s2 = sphi %s4048_s2, %s5047_s2  }
  0x27   : > { %4973 = sst [smem:[#allocation30_spill]] %s3886_s27  ;;  %p2843_p0 = scmp.ge.s32.totalorder %s3914_s5, 1 }
  0x28   : > { %4974 = sst [smem:[#allocation31_spill]] %s3890_s3  ;;  %p4925_p1 = scmp.eq.s32.totalorder %s4104_s22, 0 }
  0x29   : > { %4975 = sst [smem:[#allocation32_spill]] %s3898_s29  ;;  %p557_p2 = scmp.lt.s32.totalorder %s3914_s5, 5 }
  0x2a   : > { %4976 = sst [smem:[#allocation33_spill]] %s3902_s0  ;;  %s3916_s1 = smov [#allocation10]  }
  0x2b   : > { %4977 = sst [smem:[#allocation34_spill]] %s4104_s22  ;;  %p4109_p3 = pnand %p2843_p0, %p557_p2 }
  0x2c   : > { %s575_s24 = sshll.u32 %s3916_s1, 4  ;;  %s3917_s20 = smov [#allocation13]   ;;  %s4113_s24 = int_to_ptr.vmem [resolvable:$true] %s575_s24 }
  0x2d   : > { %s4978_s23 = scalar_select %p4109_p3, 1, 0 }
  0x2e   : > { %p3234_p4 = pneg %p4109_p3  ;;  %s610_s29 = sshll.u32 %s3917_s20, 4  ;;  %s4123_s29 = int_to_ptr.vmem [resolvable:$true] %s610_s29 }
  0x2f   : > { %4979 = sst [smem:[#allocation35_spill]] %s4978_s23  ;;  %s3918_s18 = smov [#allocation16]  }
  0x30   : > { %p4119_p5 = pnand %p3234_p4, %p4925_p1  ;;  %s4125_s19 = sshll.u32 %s3918_s18, 4  ;;  %s638_s19 = int_to_ptr.vmem [resolvable:$true] %s4125_s19 }
  0x31   : > { %s4981_s7 = sld [smem:[#allocation45_spill]] }
  0x32   : > { %s4980_s21 = scalar_select %p4119_p5, 1, 0 }
  0x33   : > { %p4135_p7 = pneg %p4119_p5 }
  0x37   : > { %s3486_s1 = scalar_lea.hbm %s4981_s7, 512 }
  0x38   : > { %p3487_p6 = scmp.ne.s32.totalorder %s4981_s7, %s3486_s1  ;;  %p3493_p10 = scmp.lt.u32.totalorder %s3486_s1, %s4981_s7 }
  0x3a   : > { %p3489_p8 = pnand %p4135_p7, %p3487_p6 }
  0x3c   : > { %p3490_p9 = pneg %p3489_p8 }
  0x3e   : > { %p3495_p11 = pnand %p3493_p10, %p3490_p9 }
  0x40   : > { %3498 = shalt.err (!%p3495_p11)
}
  0x41   : > { %s3499_s9 = scalar_lea.vmem %s4113_s24, 512  ;;  %p3507_p2 = scmp.lt.s32.totalorder %s4113_s24, %s4113_s24 }
  0x42   : > { %p3500_p12 = scmp.ne.s32.totalorder %s4113_s24, %s3499_s9  ;;  %p3508_p4 = scmp.lt.s32.totalorder %s3499_s9, %s3499_s9 }
  0x44   : > { %p3502_p13 = pnand %p3500_p12, %p4135_p7  ;;  %p3509_p6 = por %p3508_p4, %p3507_p2 }
  0x46   : > { %p3503_p0 = pneg %p3502_p13 }
  0x48   : > { %p3510_p8 = pnand %p3509_p6, %p3503_p0 }
  0x4a   : > { %3513 = shalt.err (!%p3510_p8)
}
  0x4b   : > { %s4928_s10 = smov 64   ;;  %s4947_s11 = smov 4  }
  0x4c   : > { %3237 = dma.hbm_to_vmem [thread:$0]  (!%p4119_p5), %s4981_s7, 512, %s4113_s24, [#allocation11], %s4928_s10, %s4928_s10, %s4947_s11  }
  0x4d   : > { %s4983_s12 = sld [smem:[#allocation50_spill]] }
  0x53   : > { %s3514_s9 = scalar_lea.hbm %s4983_s12, 512 }
  0x54   : > { %p3515_p9 = scmp.ne.s32.totalorder %s4983_s12, %s3514_s9  ;;  %p3521_p12 = scmp.lt.u32.totalorder %s3514_s9, %s4983_s12 }
  0x56   : > { %p3517_p10 = pnand %p3515_p9, %p4135_p7 }
  0x58   : > { %p3518_p11 = pneg %p3517_p10 }
  0x5a   : > { %p3523_p13 = pnand %p3521_p12, %p3518_p11 }
  0x5c   : > { %3526 = shalt.err (!%p3523_p13)
}
  0x5d   : > { %s3527_s24 = scalar_lea.vmem %s4123_s29, 512  ;;  %p3535_p6 = scmp.lt.s32.totalorder %s4123_s29, %s4123_s29 }
  0x5e   : > { %p3528_p0 = scmp.ne.s32.totalorder %s4123_s29, %s3527_s24  ;;  %p3536_p8 = scmp.lt.s32.totalorder %s3527_s24, %s3527_s24 }
  0x60   : > { %p3530_p2 = pnand %p3528_p0, %p4135_p7  ;;  %p3537_p9 = por %p3536_p8, %p3535_p6 }
  0x62   : > { %p3531_p4 = pneg %p3530_p2 }
  0x64   : > { %p3538_p10 = pnand %p3537_p9, %p3531_p4 }
  0x66   : > { %3541 = shalt.err (!%p3538_p10)
}
  0x67   : > { %3243 = dma.hbm_to_vmem [thread:$0]  (!%p4119_p5), %s4983_s12, 512, %s4123_s29, [#allocation14], %s4928_s10, %s4928_s10, %s4947_s11  }
  0x68   : > { %s4984_s14 = sld [smem:[#allocation52_spill]] }
  0x6e   : > { %s3542_s17 = scalar_lea.hbm %s4984_s14, 16 }
  0x6f   : > { %p3543_p11 = scmp.ne.s32.totalorder %s4984_s14, %s3542_s17  ;;  %p3549_p0 = scmp.lt.u32.totalorder %s3542_s17, %s4984_s14 }
  0x71   : > { %p3545_p12 = pnand %p3543_p11, %p4135_p7 }
  0x73   : > { %p3546_p13 = pneg %p3545_p12 }
  0x75   : > { %p3551_p2 = pnand %p3549_p0, %p3546_p13 }
  0x77   : > { %3554 = shalt.err (!%p3551_p2)
}
  0x78   : > { %s3555_s24 = scalar_lea.vmem %s638_s19, 16  ;;  %s3562_s29 = scalar_lea.vmem %s638_s19, 32 }
  0x79   : > { %p3556_p4 = scmp.ne.s32.totalorder %s638_s19, %s3555_s24  ;;  %p3563_p9 = scmp.lt.s32.totalorder %s638_s19, %s638_s19 }
  0x7a   : > { %p3564_p10 = scmp.lt.s32.totalorder %s3562_s29, %s3555_s24 }
  0x7b   : > { %p3558_p6 = pnand %p3556_p4, %p4135_p7 }
  0x7c   : > { %p3565_p1 = por %p3564_p10, %p3563_p9 }
  0x7d   : > { %p3559_p8 = pneg %p3558_p6 }
  0x7f   : > { %p3566_p3 = pnand %p3565_p1, %p3559_p8 }
  0x81   : > { %3569 = shalt.err (!%p3566_p3)
}
  0x82   : > { %3249 = dma.hbm_to_vmem [thread:$0]  (!%p4119_p5), %s4984_s14, 16, %s638_s19, [#allocation17]  }
  0x83   : > { %p4931_p1 = scmp.eq.s32.totalorder %s3914_s5, 0  ;;  %p150_p3 = scmp.ne.s32.totalorder %s3882_s26, %s3878_s25 }
  0x84   : > { %p156_p11 = scmp.ne.s32.totalorder %s3878_s25, %s3874_s2  ;;  %p4930_p12 = scmp.lt.s32.totalorder %s3914_s5, 4 }
  0x85   : > { %s718_s0 = sand.u32 1, %s3914_s5   ;;  %p152_p13 = por %p150_p3, %p4931_p1 }
  0x86   : > { %p4985_p0 = scmp.eq.s32.totalorder %s4104_s22, 0  ;;  %s720_s17 = sand.u32 1, %s3882_s26  }
  0x87   : > { %s4220_s1 = sshll.u32 %s720_s17, 4  ;;  %s4927_s20 = sshll.u32 %s3910_s30, 8 }
  0x88   : > { %p4215_p2 = por %p156_p11, %p4985_p0  ;;  %s4988_s9 = sld [smem:[#allocation41_spill]] }
  0x89   : > { %s722_s2 = scalar_lea.vmem [#allocation7], %s4220_s1  ;;  %p4233_p4 = pnand %p4930_p12, %p152_p13 }
  0x8a   : > { %s4986_s23 = scalar_select %p4215_p2, 1, 0 }
  0x8b   : > { %s729_s29 = sshll.u32 %s722_s2, 4  ;;  %s4239_s3 = scalar_lea.sflag [#allocation8], %s718_s0  ;;  %s4237_s29 = int_to_ptr.vmem [resolvable:$true] %s729_s29 }
  0x8c   : > { %4987 = sst [smem:[#allocation36_spill]] %s4986_s23  ;;  %p4944_p8 = pneg %p4233_p4 }
  0x8d   : > { %s4989_s27 = scalar_select %p4233_p4, 1, 0 }
  0x8e   : > { %s4228_s24 = scalar_lea.hbm %s4988_s9, %s4927_s20  ;;  %s3575_s2 = scalar_lea.hbm %s4988_s9, 512 }
  0x8f   : > { %4990 = sst [smem:[#allocation37_spill]] %s4989_s27  ;;  %s3570_s17 = scalar_lea.hbm %s4228_s24, 256 }
  0x90   : > { %p3571_p6 = scmp.ne.s32.totalorder %s4228_s24, %s3570_s17  ;;  %p3576_p3 = scmp.lt.u32.totalorder %s4228_s24, %s4988_s9 }
  0x91   : > { %p3577_p11 = scmp.lt.u32.totalorder %s3575_s2, %s3570_s17  ;;  %p3579_p0 = scmp.lt.u32.totalorder %s3570_s17, %s4228_s24 }
  0x92   : > { %p3573_p9 = pnand %p4944_p8, %p3571_p6 }
  0x93   : > { %p3578_p13 = por %p3577_p11, %p3576_p3 }
  0x94   : > { %p3574_p10 = pneg %p3573_p9 }
  0x95   : > { %p3580_p12 = por %p3579_p0, %p3578_p13 }
  0x97   : > { %p3581_p1 = pnand %p3580_p12, %p3574_p10 }
  0x99   : > { %3584 = shalt.err (!%p3581_p1)
}
  0x9a   : > { %s3585_s0 = scalar_lea.vmem %s4237_s29, 256  ;;  %s3921_s18 = smov [#allocation7]  }
  0x9b   : > { %p3586_p6 = scmp.ne.s32.totalorder %s4237_s29, %s3585_s0  ;;  %s3590_s19 = sshll.u32 %s3921_s18, 4  ;;  %s3591_s19 = int_to_ptr.vmem [resolvable:$false] %s3590_s19 }
  0x9c   : > { %s3592_s10 = scalar_lea.vmem %s3591_s19, 512  ;;  %p3593_p5 = scmp.lt.s32.totalorder %s4237_s29, %s3591_s19 }
  0x9d   : > { %p3588_p9 = pnand %p3586_p6, %p4944_p8  ;;  %p3594_p3 = scmp.lt.s32.totalorder %s3592_s10, %s3585_s0 }
  0x9f   : > { %p3589_p2 = pneg %p3588_p9  ;;  %p3595_p11 = por %p3594_p3, %p3593_p5 }
  0xa1   : > { %p3596_p13 = pnand %p3595_p11, %p3589_p2 }
  0xa3   : > { %3599 = shalt.err (!%p3596_p13)
}
  0xa4   : > { %s4991_s20 = smov 64   ;;  %s4992_s17 = sshll.u32 %s3910_s30, 8 }
  0xa5   : > { %3262 = dma.hbm_to_vmem [thread:$0]  (!%p4233_p4), %s4228_s24, 256, %s4237_s29, %s4239_s3, %s4991_s20, %s4991_s20, %s4947_s11  }
  0xa6   : > { %s4993_s19 = sld [smem:[#allocation42_spill]]  ;;  %s743_s10 = scalar_lea.vmem [#allocation9], %s4220_s1 }
  0xa7   : > { %s4278_s7 = sshll.u32 %s743_s10, 4  ;;  %s3922_s9 = smov [#allocation12]   ;;  %s4359_s7 = int_to_ptr.vmem [resolvable:$true] %s4278_s7 }
  0xa8   : > { %s588_s12 = sshll.u32 %s3922_s9, 4  ;;  %s4994_s8 = sld [smem:[#allocation46_spill]]  ;;  %s589_s12 = int_to_ptr.vmem [resolvable:$true] %s588_s12 }
  0xac   : > { %s4275_s0 = scalar_lea.hbm %s4993_s19, %s4992_s17 }
  0xae   : > { %s3600_s25 = scalar_lea.hbm %s4994_s8, 512 }
  0xaf   : > { %p3601_p5 = scmp.ne.s32.totalorder %s4994_s8, %s3600_s25  ;;  %p3607_p2 = scmp.lt.u32.totalorder %s3600_s25, %s4994_s8 }
  0xb1   : > { %p3603_p1 = pnand %p3601_p5, %p4135_p7 }
  0xb3   : > { %p3604_p12 = pneg %p3603_p1 }
  0xb5   : > { %p3609_p10 = pnand %p3607_p2, %p3604_p12 }
  0xb7   : > { %3612 = shalt.err (!%p3609_p10)
}
  0xb8   : > { %s3613_s1 = scalar_lea.vmem %s589_s12, 512  ;;  %p3621_p3 = scmp.lt.s32.totalorder %s589_s12, %s589_s12 }
  0xb9   : > { %p3614_p0 = scmp.ne.s32.totalorder %s589_s12, %s3613_s1  ;;  %p3622_p11 = scmp.lt.s32.totalorder %s3613_s1, %s3613_s1 }
  0xbb   : > { %p3616_p6 = pnand %p3614_p0, %p4135_p7  ;;  %p3623_p13 = por %p3622_p11, %p3621_p3 }
  0xbd   : > { %p3617_p9 = pneg %p3616_p6 }
  0xbf   : > { %p3624_p8 = pnand %p3623_p13, %p3617_p9 }
  0xc1   : > { %3627 = shalt.err (!%p3624_p8)
}
  0xc2   : > { %p4995_p5 = scmp.ne.s32.totalorder %s4980_s21, 0  ;;  %s3923_s22 = smov [#allocation15]  }
  0xc3   : > { %s623_s23 = sshll.u32 %s3923_s22, 4  ;;  %s3924_s9 = smov [#allocation18]   ;;  %s624_s23 = int_to_ptr.vmem [resolvable:$true] %s623_s23 }
  0xc4   : > { %3240 = dma.hbm_to_vmem [thread:$0]  (!%p4995_p5), %s4994_s8, 512, %s589_s12, [#allocation11], %s4991_s20, %s4991_s20, %s4947_s11  }
  0xc5   : > { %s648_s27 = sshll.u32 %s3924_s9, 4  ;;  %s4996_s13 = sld [smem:[#allocation51_spill]]  ;;  %s649_s27 = int_to_ptr.vmem [resolvable:$true] %s648_s27 }
  0xcb   : > { %s3628_s18 = scalar_lea.hbm %s4996_s13, 512 }
  0xcc   : > { %p3629_p8 = scmp.ne.s32.totalorder %s4996_s13, %s3628_s18  ;;  %p3635_p2 = scmp.lt.u32.totalorder %s3628_s18, %s4996_s13 }
  0xce   : > { %p3631_p1 = pnand %p3629_p8, %p4135_p7 }
  0xd0   : > { %p3632_p12 = pneg %p3631_p1 }
  0xd2   : > { %p3637_p10 = pnand %p3635_p2, %p3632_p12 }
  0xd4   : > { %3640 = shalt.err (!%p3637_p10)
}
  0xd5   : > { %s3641_s12 = scalar_lea.vmem %s624_s23, 512  ;;  %p3649_p3 = scmp.lt.s32.totalorder %s624_s23, %s624_s23 }
  0xd6   : > { %p3642_p0 = scmp.ne.s32.totalorder %s624_s23, %s3641_s12  ;;  %p3650_p11 = scmp.lt.s32.totalorder %s3641_s12, %s3641_s12 }
  0xd8   : > { %p3644_p6 = pnand %p3642_p0, %p4135_p7  ;;  %p3651_p13 = por %p3650_p11, %p3649_p3 }
  0xda   : > { %p3645_p9 = pneg %p3644_p6 }
  0xdc   : > { %p3652_p4 = pnand %p3651_p13, %p3645_p9 }
  0xde   : > { %3655 = shalt.err (!%p3652_p4)
}
  0xdf   : > { %3246 = dma.hbm_to_vmem [thread:$0]  (!%p4995_p5), %s4996_s13, 512, %s624_s23, [#allocation14], %s4991_s20, %s4991_s20, %s4947_s11  }
  0xe0   : > { %s4997_s15 = sld [smem:[#allocation53_spill]] }
  0xe6   : > { %s3656_s17 = scalar_lea.hbm %s4997_s15, 16 }
  0xe7   : > { %p3657_p8 = scmp.ne.s32.totalorder %s4997_s15, %s3656_s17  ;;  %p3663_p12 = scmp.lt.u32.totalorder %s3656_s17, %s4997_s15 }
  0xe9   : > { %p3659_p4 = pnand %p3657_p8, %p4135_p7 }
  0xeb   : > { %p3660_p1 = pneg %p3659_p4 }
  0xed   : > { %p3665_p2 = pnand %p3663_p12, %p3660_p1 }
  0xef   : > { %3668 = shalt.err (!%p3665_p2)
}
  0xf0   : > { %s3669_s29 = scalar_lea.vmem %s649_s27, 16  ;;  %s3676_s23 = scalar_lea.vmem %s649_s27, 32 }
  0xf1   : > { %p3670_p10 = scmp.ne.s32.totalorder %s649_s27, %s3669_s29  ;;  %p3677_p9 = scmp.lt.s32.totalorder %s649_s27, %s649_s27 }
  0xf2   : > { %p3678_p3 = scmp.lt.s32.totalorder %s3676_s23, %s3669_s29 }
  0xf3   : > { %p3672_p0 = pnand %p3670_p10, %p4135_p7 }
  0xf4   : > { %p3679_p11 = por %p3678_p3, %p3677_p9 }
  0xf5   : > { %p3673_p6 = pneg %p3672_p0 }
  0xf7   : > { %p3680_p13 = pnand %p3679_p11, %p3673_p6 }
  0xf9   : > { %3683 = shalt.err (!%p3680_p13)
}
  0xfa   : > { %3252 = dma.hbm_to_vmem [thread:$0]  (!%p4995_p5), %s4997_s15, 16, %s649_s27, [#allocation17]  }
  0xfb   : > { %s3925_s14 = smov [#allocation19]   ;;  %s4998_s16 = sld [smem:[#allocation54_spill]] }
  0xfc   : > { %s659_s25 = sshll.u32 %s3925_s14, 4  ;;  %s660_s25 = int_to_ptr.vmem [resolvable:$true] %s659_s25 }
 0x101   : > { %s3684_s17 = scalar_lea.hbm %s4998_s16, 16 }
 0x102   : > { %p3685_p8 = scmp.ne.s32.totalorder %s4998_s16, %s3684_s17  ;;  %p3691_p12 = scmp.lt.u32.totalorder %s3684_s17, %s4998_s16 }
 0x104   : > { %p3687_p4 = pnand %p3685_p8, %p4135_p7 }
 0x106   : > { %p3688_p1 = pneg %p3687_p4 }
 0x108   : > { %p3693_p2 = pnand %p3691_p12, %p3688_p1 }
 0x10a   : > { %3696 = shalt.err (!%p3693_p2)
}
 0x10b   : > { %s3697_s27 = scalar_lea.vmem %s660_s25, 16  ;;  %s3704_s29 = scalar_lea.vmem %s660_s25, 32 }
 0x10c   : > { %p3698_p10 = scmp.ne.s32.totalorder %s660_s25, %s3697_s27  ;;  %p3705_p9 = scmp.lt.s32.totalorder %s660_s25, %s660_s25 }
 0x10d   : > { %p3706_p3 = scmp.lt.s32.totalorder %s3704_s29, %s3697_s27 }
 0x10e   : > { %p3700_p0 = pnand %p3698_p10, %p4135_p7 }
 0x10f   : > { %p3707_p11 = por %p3706_p3, %p3705_p9 }
 0x110   : > { %p3701_p6 = pneg %p3700_p0 }
 0x112   : > { %p3708_p13 = pnand %p3707_p11, %p3701_p6 }
 0x114   : > { %3711 = shalt.err (!%p3708_p13)
}
 0x115   : > { %s4999_s6 = sld [smem:[#allocation31_spill]]  ;;  %s5000_s12 = sld [smem:[#allocation30_spill]] }
 0x116   : > { %s5001_s14 = sld [smem:[#allocation34_spill]]  ;;  %s53_s21 = sadd.s32 1, %s3906_s4 }
 0x117   : > { %3255 = dma.hbm_to_vmem [thread:$0]  (!%p4995_p5), %s4998_s16, 16, %s660_s25, [#allocation20]  }
 0x118   : > { %p54_p7 = scmp.ge.s32.totalorder %s53_s21, 2  ;;  %s56_s22 = sadd.s32 1, %s3910_s30 }
 0x119   : > { %s2842_s9 = sadd.s32 4294967294, %s3914_s5   ;;  %s65_s17 = sadd.s32 1, %s3894_s28 }
 0x11a   : > { %s5058_s21 = smov (%p54_p7, %s53_s21), 0  ;;  %s5060_s22 = smov (!%p54_p7, %s56_s22), %s3910_s30 }
 0x11b   : > { %s61_s2 = ssub.s32 %s3906_s4, %s5058_s21  ;;  %p72_p8 = scmp.ne.s32.totalorder %s3894_s28, %s4999_s6 }
 0x11c   : > { %p58_p5 = scmp.ge.s32.totalorder %s5060_s22, 2  ;;  %p78_p4 = scmp.ne.s32.totalorder %s4999_s6, %s5000_s12 }
 0x11d   : > { %s143_s25 = sadd.s32 1, %s3882_s26  ;;  %p544_p1 = scmp.eq.s32.totalorder %s5001_s14, 3 }
 0x11e   : > { %s5062_s22 = smov (%p58_p5, %s5060_s22), 0  ;;  %p5002_p12 = scmp.eq.s32.totalorder %s5001_s14, 0 }
 0x11f   : > { %p4387_p10 = por %p544_p1, %p72_p8  ;;  %s60_s24 = ssub.s32 %s3910_s30, %s5062_s22 }
 0x120   : > { %p4380_p2 = por %p5002_p12, %p78_p4  ;;  %p550_p0 = scmp.eq.s32.totalorder %s2842_s9, 3 }
 0x121   : > { %s5004_s10 = scalar_select %p4387_p10, 1, 0 }
 0x122   : > { %s5003_s18 = scalar_select %p4380_p2, 1, 0 }
 0x123   : > { %s62_s27 = sor.u32 %s61_s2, %s60_s24  ;;  %p141_p6 = scmp.eq.s32.totalorder %s60_s24, 0 }
 0x124   : > { %p63_p9 = scmp.eq.s32.totalorder %s62_s27, 0  ;;  %p4393_p3 = por %p550_p0, %p78_p4 }
 0x125   : > { %s5006_s23 = sld [smem:[#allocation37_spill]]  ;;  %s682_s14 = sand.u32 1, %s3894_s28  }
 0x126   : > { %s5005_s29 = scalar_select %p4393_p3, 1, 0 }
 0x127   : > { %s4398_s1 = scalar_select %p141_p6, %s3882_s26, %s143_s25  }
 0x128   : > { %s4401_s12 = scalar_select %p63_p9, %s3894_s28, %s65_s17  }
 0x129   : > { %s2853_s11 = sshll.u32 %s3910_s30, 1  ;;  %p5007_p11 = scmp.eq.s32.totalorder %s3914_s5, 0 }
 0x12a   : > { %s2852_s9 = sshll.u32 %s682_s14, 3  ;;  %s691_s2 = sadd.s32 %s3906_s4, %s2853_s11 }
 0x12b   : > { %p74_p13 = por %p5007_p11, %p72_p8  ;;  %s2854_s24 = sshll.u32 %s691_s2, 7 }
 0x12c   : > { %s686_s27 = scalar_lea.vmem [#allocation4], %s2852_s9  ;;  %s5008_s16 = sld [smem:[#allocation38_spill]] }
 0x12d   : > { %s695_s8 = sshll.u32 %s686_s27, 4  ;;  %p5009_p7 = scmp.lt.s32.totalorder %s3914_s5, 4  ;;  %s4418_s8 = int_to_ptr.vmem [resolvable:$true] %s695_s8 }
 0x12e   : > { %s3712_s6 = scalar_lea.hbm %s4275_s0, 256  ;;  %p5011_p4 = scmp.ne.s32.totalorder %s5006_s23, 0 }
 0x12f   : > { %p4422_p5 = pnand %p5009_p7, %p74_p13  ;;  %p3713_p8 = scmp.ne.s32.totalorder %s4275_s0, %s3712_s6 }
 0x130   : > { %p5012_p1 = pneg %p5011_p4  ;;  %s3717_s2 = scalar_lea.hbm %s4993_s19, 512 }
 0x131   : > { %p3718_p6 = scmp.lt.u32.totalorder %s4275_s0, %s4993_s19  ;;  %p3719_p9 = scmp.lt.u32.totalorder %s3717_s2, %s3712_s6 }
 0x132   : > { %s4416_s25 = scalar_lea.hbm %s5008_s16, %s2854_s24  ;;  %p3715_p12 = pnand %p3713_p8, %p5012_p1 }
 0x133   : > { %p3720_p11 = por %p3719_p9, %p3718_p6  ;;  %p3721_p13 = scmp.lt.u32.totalorder %s3712_s6, %s4275_s0 }
 0x134   : > { %p3716_p0 = pneg %p3715_p12 }
 0x135   : > { %p3722_p7 = por %p3721_p13, %p3720_p11 }
 0x137   : > { %p3723_p3 = pnand %p3722_p7, %p3716_p0 }
 0x139   : > { %3726 = shalt.err (!%p3723_p3)
}
 0x13a   : > { %s3727_s24 = scalar_lea.vmem %s4359_s7, 256  ;;  %s3926_s27 = smov [#allocation9]  }
 0x13b   : > { %p3728_p8 = scmp.ne.s32.totalorder %s4359_s7, %s3727_s24  ;;  %s3732_s11 = sshll.u32 %s3926_s27, 4  ;;  %s3733_s11 = int_to_ptr.vmem [resolvable:$false] %s3732_s11 }
 0x13c   : > { %s3734_s9 = scalar_lea.vmem %s3733_s11, 512  ;;  %p3735_p2 = scmp.lt.s32.totalorder %s4359_s7, %s3733_s11 }
 0x13d   : > { %p3730_p12 = pnand %p3728_p8, %p5012_p1  ;;  %p3736_p6 = scmp.lt.s32.totalorder %s3734_s9, %s3727_s24 }
 0x13f   : > { %p3731_p10 = pneg %p3730_p12  ;;  %p3737_p9 = por %p3736_p6, %p3735_p2 }
 0x141   : > { %p3738_p11 = pnand %p3737_p9, %p3731_p10 }
 0x143   : > { %3741 = shalt.err (!%p3738_p11)
}
 0x144   : > { %s5013_s6 = smov 4   ;;  %s683_s2 = scalar_lea.sflag [#allocation5], %s682_s14 }
 0x145   : > { %3265 = dma.hbm_to_vmem [thread:$0]  (!%p5011_p4), %s4275_s0, 256, %s4359_s7, %s4239_s3, %s4991_s20, %s4991_s20, %s5013_s6  }
 0x146   : > { %s3742_s13 = scalar_lea.hbm %s4416_s25, 128  ;;  %p3744_p10 = pneg %p4422_p5 }
 0x147   : > { %p3743_p2 = scmp.ne.s32.totalorder %s4416_s25, %s3742_s13  ;;  %s3747_s24 = scalar_lea.hbm %s5008_s16, 512 }
 0x148   : > { %p3748_p13 = scmp.lt.u32.totalorder %s4416_s25, %s5008_s16  ;;  %p3749_p7 = scmp.lt.u32.totalorder %s3747_s24, %s3742_s13 }
 0x149   : > { %p3745_p3 = pnand %p3744_p10, %p3743_p2  ;;  %p3751_p8 = scmp.lt.u32.totalorder %s3742_s13, %s4416_s25 }
 0x14a   : > { %p3750_p4 = por %p3749_p7, %p3748_p13 }
 0x14b   : > { %p3746_p0 = pneg %p3745_p3 }
 0x14c   : > { %p3752_p1 = por %p3751_p8, %p3750_p4 }
 0x14e   : > { %p3753_p12 = pnand %p3752_p1, %p3746_p0 }
 0x150   : > { %3756 = shalt.err (!%p3753_p12)
}
 0x151   : > { %s3757_s7 = scalar_lea.vmem %s4418_s8, 128  ;;  %s3927_s3 = smov [#allocation4]  }
 0x152   : > { %p3758_p6 = scmp.ne.s32.totalorder %s4418_s8, %s3757_s7  ;;  %s3762_s20 = sshll.u32 %s3927_s3, 4  ;;  %s3763_s20 = int_to_ptr.vmem [resolvable:$false] %s3762_s20 }
 0x153   : > { %s3764_s0 = scalar_lea.vmem %s3763_s20, 256  ;;  %p3765_p2 = scmp.lt.s32.totalorder %s4418_s8, %s3763_s20 }
 0x154   : > { %p3760_p9 = pnand %p3758_p6, %p3744_p10  ;;  %p3766_p3 = scmp.lt.s32.totalorder %s3764_s0, %s3757_s7 }
 0x156   : > { %p3761_p11 = pneg %p3760_p9  ;;  %p3767_p13 = por %p3766_p3, %p3765_p2 }
 0x158   : > { %p3768_p7 = pnand %p3767_p13, %p3761_p11 }
 0x15a   : > { %3771 = shalt.err (!%p3768_p7)
}
 0x15b   : > { %3259 = dma.hbm_to_vmem [thread:$0]  (!%p4422_p5), %s4416_s25, 128, %s4418_s8, %s683_s2  }
 0x15c   : > { %s5014_s14 = sld [smem:[#allocation35_spill]] }
 0x162   : > { %p5015_p0 = scmp.ne.s32.totalorder %s5014_s14, 0 }
 0x163   : > { %s5016_s9 = sld [smem:[#allocation31_spill]] (!%p5015_p0)  ;;  %p5017_p10 = scmp.ne.s32.totalorder (!%p5015_p0), %s5003_s18, 0 }
 0x164   : > { %762 = sbr.rel (%p5015_p0) target bundleno = 4222 (0x107e), region = 104 }
 0x169   : > { %s4483_s6 = sand.u32 (!%p5015_p0), 1, %s5016_s9  }
 0x16a   : > { %s2862_s13 = sshll.u32 (!%p5015_p0), %s4483_s6, 3  ;;  %s765_s23 = scalar_lea.sflag (!%p5015_p0), [#allocation5], %s4483_s6 }
 0x16b   : > { %s768_s15 = scalar_lea.vmem [#allocation4], %s2862_s13 }
 0x16c   : > { %3845 = dma.done.wait (%p5017_p10), %s765_s23, 128  }
 0x16d   : > { %3847 = vsyncadd (%p5017_p10), %s765_s23, 4294967168  ;;  %s5018_s8 = sld [smem:[#allocation34_spill]]  ;;  %s5019_s25 = sld [smem:[#allocation29_spill]] }
 0x16e   : > { %s5020_s17 = sld [smem:[#allocation36_spill]] }
 0x173   : > { %s773_s2 = sand.u32 1, %s5018_s8   ;;  %s775_s24 = sand.u32 1, %s5019_s25  }
 0x174   : > { %s2863_s27 = sshll.u32 %s775_s24, 4  ;;  %s774_s11 = scalar_lea.sflag [#allocation8], %s773_s2 }
 0x175   : > { %s4495_s7 = scalar_lea.vmem [#allocation7], %s2863_s27  ;;  %p5021_p5 = scmp.ne.s32.totalorder %s5020_s17, 0 }
 0x177   : > { %3849 = dma.done.wait (%p5021_p5), %s774_s11, 512  }
 0x178   : > { %3851 = vsyncadd (%p5021_p5), %s774_s11, 4294966784  ;;  %s4501_s3 = scalar_lea.vmem [#allocation9], %s2863_s27  ;;  %p5022_p4 = scmp.eq.s32.totalorder %s5018_s8, 0 }
 0x17a   : > { %3853 = dma.done.wait (%p5022_p4), [#allocation11], 1024   ;;  %p5023_p8 = pmov %p5022_p4 }
 0x17b   : > { %p5024_p1 = pmov %p5022_p4 }
 0x17c   : > { %3855 = vsyncadd (%p5023_p8), [#allocation11], 4294966272 }
 0x17d   : > { %3857 = dma.done.wait (%p5024_p1), [#allocation14], 1024   ;;  %p5025_p12 = pmov %p5024_p1 }
 0x17e   : > { %p5026_p6 = pmov %p5024_p1 }
 0x17f   : > { %3859 = vsyncadd (%p5025_p12), [#allocation14], 4294966272 }
 0x180   : > { %3861 = dma.done.wait (%p5026_p6), [#allocation17], 32   ;;  %p5027_p9 = pmov %p5024_p1 }
 0x181   : > { %p5028_p11 = pmov %p5024_p1 }
 0x182   : > { %3863 = vsyncadd (%p5027_p9), [#allocation17], 4294967264 }
 0x183   : > { %3865 = dma.done.wait (%p5028_p11), [#allocation20], 16   ;;  %p5029_p2 = pmov %p5024_p1 }
 0x184   : > { %vm905_vm0 = vcmask 523264   ;;  %v4519_v0 = vld [vmem:[%s768_s15] sm:$0xff]  ;;  %v3392_v4 = vld [vmem:[#allocation10] sm:$0xff]   ;;  %v3928_v5 = vmov 0.0   ;;  %vm3929_vm1 = vmmov 0   ;;  %v3393_v6 = vld [vmem:[#allocation10 + $0x8] sm:$0xff]  }
 0x185   : > { %3867 = vsyncadd (%p5029_p2), [#allocation20], 4294967280  ;;  %v906_v1 = vsel %vm905_vm0, %v4519_v0, 0.0  ;;  %v911_v2 = vmul.f32 %v4519_v0, %v4519_v0  ;;  %3054 = vmatprep.subr.bf16.mxu1 %v3928_v5  ;;  %3062 = vmatprep.mubr.msk.bf16.mxu1 %vm3929_vm1, %v3928_v5  ;;  %v3394_v7 = vld [vmem:[#allocation10 + $0x10] sm:$0xff]   ;;  %v3395_v8 = vld [vmem:[#allocation10 + $0x18] sm:$0xff]   ;;  %s5030_s18 = sld [smem:[#allocation33_spill]] }
 0x186   : > { %907 = vadd.xlane.f32.xlu0 %v906_v1  ;;  %3055 = vmatpush3.bf16.msra.mxu1 %v3392_v4  ;;  %s5031_s14 = sld [smem:[#allocation43_spill]]  ;;  %s5032_s15 = sld [smem:[#allocation44_spill]]  ;;  %vm1060_vm2 = vcmask 130048   ;;  %vm1015_vm3 = vcmask 125952   ;;  %vm1513_vm4 = vcmask 257152   ;;  %vm1522_vm5 = vcmask 388352  }
 0x187   : > { %v912_v3 = vsel %vm905_vm0, %v911_v2, 0.0  ;;  %3078 = vmatprep.subr.bf16.mxu0 %v3928_v5  ;;  %3056 = vmatprep.subr.bf16.mxu1 %v3928_v5  ;;  %s5033_s24 = sld [smem:[#allocation39_spill]]  ;;  %s3930_s11 = smov 80   ;;  %vm1531_vm6 = vcmask 519552   ;;  %vm1937_vm7 = vcmask 64512   ;;  %vm1989_vm8 = vcmask 1043456  }
 0x188   : > { %3080 = vmatprep.mubr.msk.bf16.mxu0 %vm3929_vm1, %v3928_v5  ;;  %s3931_s20 = smov 112   ;;  %s3932_s0 = smov 96  }
 0x189   : > { %s5034_s23 = sld [smem:[#allocation40_spill]]  ;;  %s3935_s17 = smov 48  }
 0x18a   : > { %913 = vadd.xlane.f32.xlu0 %v912_v3  ;;  %3057 = vmatpush3.bf16.msra.mxu1 %v3393_v6  ;;  %s5041_s2 = sld [smem:[#allocation32_spill]]  ;;  %s5043_s9 = sld [smem:[#allocation59_spill]] }
 0x18b   : > { %3058 = vmatprep.subr.bf16.mxu1 %v3928_v5  ;;  %p893_p3 = scmp.lt.s32.totalorder %s5030_s18, 1  ;;  %p5044_p7 = scmp.ne.s32.totalorder %s5004_s10, 0 }
 0x18c   : > { %v2877_v18 = vld [vmem:[%s5031_s14] ss:$0 sm:$0xff] }
 0x18d   : > { %v2878_v20 = vld [vmem:[%s5032_s15] ss:$0 sm:$0xff]  ;;  %s4548_s8 = scalar_select %p893_p3, %s5030_s18, 1 }
 0x18e   : > { %3059 = vmatpush3.bf16.msra.mxu1 %v3394_v7 }
 0x18f   : > { %3060 = vmatprep.subr.bf16.mxu1 %v3928_v5  ;;  %s2970_s25 = sshll.u32 %s4548_s8, 5  ;;  %s3933_s8 = smov 16  }
 0x190   : > { %s4556_s27 = scalar_lea.vmem %s5033_s24, %s2970_s25  ;;  %s4599_s15 = scalar_lea.vmem %s5034_s23, %s2970_s25 }
 0x191   : > { %v3396_v24 = vld [vmem:[%s4556_s27] sm:$0xff]   ;;  %v3398_v26 = vld [vmem:[%s4556_s27 + $0x10] sm:$0xff]   ;;  %v3397_v33 = vld [vmem:[%s4556_s27 + $0x8] sm:$0xff]   ;;  %s3934_s25 = smov 32   ;;  %s5036_s23 = sld [smem:[#allocation48_spill]] }
 0x192   : > { %3061 = vmatpush3.bf16.msra.mxu1 %v3395_v8  ;;  %v1065_v25 = vsel %vm1060_vm2, %v3396_v24, 0  ;;  %v1167_v27 = vsel %vm1060_vm2, %v3398_v26, 0  ;;  %v1116_v34 = vsel %vm1060_vm2, %v3397_v33, 0  ;;  %v3399_v38 = vld [vmem:[%s4556_s27 + $0x18] sm:$0xff]   ;;  %v3400_v7 = vld [vmem:[%s4599_s15] sm:$0xff]   ;;  %s5035_s27 = sld [smem:[#allocation47_spill]] }
 0x193   : > { %3066 = vmatprep.subr.bf16.mxu1 %v3928_v5  ;;  %3079 = vmatpush3.bf16.xpose.msra.mxu0 %v1167_v27  ;;  %v1218_v40 = vsel %vm1060_vm2, %v3399_v38, 0  ;;  %v3402_v27 = vld [vmem:[%s4599_s15 + $0x10] sm:$0xff]   ;;  %s5037_s24 = sld [smem:[#allocation49_spill]] }
 0x194   : > { %3090 = vmatprep.subr.bf16.mxu0 %v3928_v5 }
 0x213   : > { %v908_v9 = vpop.xlane.xlu0 %907 }
 0x214   : > { %v910_v10 = vmul.f32 0.015625, %v908_v9 }
 0x216   : > { %v916_v12 = vmul.f32 %v910_v10, %v910_v10  ;;  %v918_v16 = vsub.f32 %v4519_v0, %v910_v10 }
 0x217   : > { %v914_v11 = vpop.xlane.xlu0 %913 }
 0x218   : > { %v915_v13 = vmul.f32 0.015625, %v914_v11 }
 0x21a   : > { %v917_v14 = vsub.f32 %v915_v13, %v916_v12 }
 0x21c   : > { %v919_v15 = vadd.f32 1e-05, %v917_v14 }
 0x21e   : > { %3444 = vrsqrt.f32 %v919_v15 }
 0x228   : > { %v3445_v17 = vpop.eup %3444 }
 0x229   : > { %v921_v19 = vmul.f32 %v3445_v17, %v918_v16 }
 0x22b   : > { %v929_v21 = vmul.f32 %v2877_v18, %v921_v19 }
 0x22d   : > { %v937_v22 = vadd.f32 %v2878_v20, %v929_v21 }
 0x22f   : > { %v938_v23 = vpack.c.bf16 %v937_v22, %v937_v22 }
 0x231   : > { %3063 = vmatmul.mubr.msk.bf16.vlgmr.msra.gmra.mrb[0].mxu1 %vm905_vm0, %v938_v23  ;;  %v3401_v23 = vld [vmem:[%s4599_s15 + $0x8] sm:$0xff]  }
 0x232   : > { %3068 = vmatprep.mubr.msk.bf16.mxu1 %vm3929_vm1, %v3928_v5  ;;  %3067 = vmatpush3.bf16.xpose.msra.mxu1 %v1065_v25 }
 0x233   : > { %3072 = vmatprep.subr.bf16.mxu1 %v3928_v5 }
 0x304   : > { %v1008_v28 = vpop.f32.mrb[0].mxu1 }
 0x305   : > { %v1014_v29 = vpack.c.bf16 %v1008_v28, %v1008_v28  ;;  %v3064_v30 = vpop.f32.mrb[1].mxu1 }
 0x306   : > { %v1011_v31 = vpop.f32.mrb[2].mxu1 }
 0x307   : > { %1016 = vst.msk [vmem:[#allocation2] sm:$0xf] %vm1015_vm3, %v1014_v29  ;;  %1030 = vrot.lane.b32.xlu0 %v1014_v29, %s3930_s11  ;;  %1020 = vrot.lane.b32.xlu1 %v1014_v29, %s3931_s20  ;;  %v3065_v32 = vpop.f32.mrb[3].mxu1 }
 0x30b   : > { %1025 = vrot.lane.b32.xlu1 %v1014_v29, %s3932_s0 }
 0x30e   : > { %v1051_v35 = vld [vmem:[#allocation2] sm:$0xf] }
 0x30f   : > { %3069 = vmatmul.mubr.msk.bf16.vlgmr.msra.gmra.mrb[4].mxu1 %vm1060_vm2, %v1051_v35 }
 0x310   : > { %3073 = vmatpush3.bf16.xpose.msra.mxu1 %v1116_v34  ;;  %3074 = vmatprep.mubr.msk.bf16.mxu1 %vm3929_vm1, %v3928_v5  ;;  %v3403_v34 = vld [vmem:[%s4599_s15 + $0x18] sm:$0xff]   ;;  %s5040_s15 = sld [smem:[#allocation56_spill]] }
 0x311   : > { %3084 = vmatprep.subr.bf16.mxu1 %v3928_v5 }
 0x379   : > { %v1031_v36 = vpop.permute.xlu0 %1030  ;;  %v1021_v37 = vpop.permute.xlu1 %1020 }
 0x37a   : > { %1034 = vst.msk [vmem:[#allocation2 + $0xc] sm:$0xf] %vm1015_vm3, %v1031_v36  ;;  %1024 = vst.msk [vmem:[#allocation2 + $0x4] sm:$0xf] %vm1015_vm3, %v1021_v37 }
 0x37d   : > { %v1026_v39 = vpop.permute.xlu1 %1025 }
 0x37e   : > { %1029 = vst.msk [vmem:[#allocation2 + $0x8] sm:$0xf] %vm1015_vm3, %v1026_v39 }
 0x381   : > { %v1052_v41 = vld [vmem:[#allocation2 + $0x4] sm:$0xf]  ;;  %v1054_v43 = vld [vmem:[#allocation2 + $0xc] sm:$0xf] }
 0x382   : > { %3075 = vmatmul.mubr.msk.bf16.vlgmr.msra.gmra.mrb[8].mxu1 %vm1060_vm2, %v1052_v41 }
 0x383   : > { %3085 = vmatpush3.bf16.xpose.msra.mxu1 %v1218_v40  ;;  %3086 = vmatprep.mubr.msk.bf16.mxu1 %vm3929_vm1, %v3928_v5 }
 0x384   : > { %3096 = vmatprep.subr.bf16.mxu1 %v3928_v5 }
 0x385   : > { %v1053_v42 = vld [vmem:[#allocation2 + $0x8] sm:$0xf] }
 0x386   : > { %3081 = vmatmul.mubr.msk.bf16.vlgmr.msra.gmra.mrb[0].mxu0 %vm1060_vm2, %v1053_v42 }
 0x387   : > { %3092 = vmatprep.mubr.msk.bf16.mxu0 %vm3929_vm1, %v3928_v5  ;;  %3091 = vmatpush3.bf16.msra.mxu0 %v3400_v7 }
 0x388   : > { %3102 = vmatprep.subr.bf16.mxu0 %v3928_v5 }
 0x38a   : > { %3087 = vmatmul.mubr.msk.bf16.vlgmr.msra.gmra.mrb[12].mxu1 %vm1060_vm2, %v1054_v43 }
 0x38b   : > { %3098 = vmatprep.mubr.msk.bf16.mxu1 %vm3929_vm1, %v3928_v5  ;;  %3097 = vmatpush3.bf16.msra.mxu1 %v3401_v23 }
 0x38c   : > { %3108 = vmatprep.subr.bf16.mxu1 %v3928_v5 }
 0x3e2   : > { %v1101_v44 = vpop.f32.mrb[4].mxu1 }
 0x3e3   : > { %v3070_v45 = vpop.f32.mrb[5].mxu1  ;;  %v1260_v46 = vsel %vm1060_vm2, %v1101_v44, -inf }
 0x3e4   : > { %1261 = vmax.xlane.f32.xlu1 %v1260_v46  ;;  %v1104_v47 = vpop.f32.mrb[6].mxu1 }
 0x3e5   : > { %v3071_v48 = vpop.f32.mrb[7].mxu1  ;;  %v3404_v47 = vld [vmem:[#allocation12] sm:$0xff]  }
 0x3e6   : > { %v3405_v48 = vld [vmem:[#allocation12 + $0x8] sm:$0xff]  }
 0x455   : > { %v1152_v49 = vpop.f32.mrb[8].mxu1 }
 0x456   : > { %v3076_v50 = vpop.f32.mrb[9].mxu1  ;;  %v1263_v51 = vsel %vm1060_vm2, %v1152_v49, -inf }
 0x457   : > { %1264 = vmax.xlane.f32.xlu0 %v1263_v51  ;;  %v1155_v52 = vpop.f32.mrb[10].mxu1  ;;  %v3407_v50 = vld [vmem:[#allocation12 + $0x18] sm:$0xff]  }
 0x458   : > { %v3077_v53 = vpop.f32.mrb[11].mxu1 }
 0x459   : > { %v1203_v54 = vpop.f32.mrb[0].mxu0 }
 0x45a   : > { %v3082_v55 = vpop.f32.mrb[1].mxu0  ;;  %v1266_v56 = vsel %vm1060_vm2, %v1203_v54, -inf }
 0x45b   : > { %v1206_v57 = vpop.f32.mrb[2].mxu0  ;;  %1267 = vmax.xlane.f32.xlu1 %v1266_v56 }
 0x45c   : > { %v3083_v58 = vpop.f32.mrb[3].mxu0 }
 0x45d   : > { %v1254_v59 = vpop.f32.mrb[12].mxu1 }
 0x45e   : > { %v3088_v60 = vpop.f32.mrb[13].mxu1  ;;  %v1269_v61 = vsel %vm1060_vm2, %v1254_v59, -inf }
 0x45f   : > { %1270 = vmax.xlane.f32.xlu1 %v1269_v61  ;;  %v1257_v62 = vpop.f32.mrb[14].mxu1 }
 0x460   : > { %v3089_v63 = vpop.f32.mrb[15].mxu1 }
 0x471   : > { %v1262_v1 = vpop.xlane.xlu1 %1261 }
 0x472   : > { %v1272_v2 = vsub.f32 %v1101_v44, %v1262_v1 }
 0x474   : > { %v1276_v3 = vmul.f32 1.442695, %v1272_v2 }
 0x476   : > { %3446 = vpow2.f32 %v1276_v3 }
 0x480   : > { %v3447_v4 = vpop.eup %3446 }
 0x481   : > { %v1284_v6 = vsel %vm1060_vm2, %v3447_v4, 0.0 }
 0x482   : > { %1285 = vadd.xlane.f32.xlu1 %v1284_v6 }
 0x4e4   : > { %v1265_v8 = vpop.xlane.xlu0 %1264 }
 0x4e5   : > { %v1273_v9 = vsub.f32 %v1152_v49, %v1265_v8  ;;  %v3406_v49 = vld [vmem:[#allocation12 + $0x10] sm:$0xff]   ;;  %v2904_v8 = vld [vmem:[%s5035_s27] ss:$0 sm:$0xff] }
 0x4e7   : > { %v1278_v10 = vmul.f32 1.442695, %v1273_v9 }
 0x4e8   : > { %v1268_v11 = vpop.xlane.xlu1 %1267 }
 0x4e9   : > { %3448 = vpow2.f32 %v1278_v10  ;;  %v1274_v12 = vsub.f32 %v1203_v54, %v1268_v11 }
 0x4eb   : > { %v1280_v13 = vmul.f32 1.442695, %v1274_v12 }
 0x4ec   : > { %v1271_v14 = vpop.xlane.xlu1 %1270 }
 0x4ed   : > { %3450 = vpow2.f32 %v1280_v13  ;;  %v1275_v15 = vsub.f32 %v1254_v59, %v1271_v14 }
 0x4ef   : > { %v1282_v16 = vmul.f32 1.442695, %v1275_v15 }
 0x4f1   : > { %3452 = vpow2.f32 %v1282_v16 }
 0x4f3   : > { %v3449_v17 = vpop.eup %3448 }
 0x4f4   : > { %v1287_v18 = vsel %vm1060_vm2, %v3449_v17, 0.0 }
 0x4f5   : > { %1288 = vadd.xlane.f32.xlu1 %v1287_v18  ;;  %v3408_v18 = vld [vmem:[#allocation13] sm:$0xff]  }
 0x4f7   : > { %v3451_v19 = vpop.eup %3450 }
 0x4f8   : > { %v1290_v20 = vsel %vm1060_vm2, %v3451_v19, 0.0 }
 0x4f9   : > { %1291 = vadd.xlane.f32.xlu1 %v1290_v20  ;;  %v3411_v20 = vld [vmem:[#allocation13 + $0x18] sm:$0xff]  }
 0x4fb   : > { %v3453_v21 = vpop.eup %3452 }
 0x4fc   : > { %v1293_v22 = vsel %vm1060_vm2, %v3453_v21, 0.0 }
 0x4fd   : > { %1294 = vadd.xlane.f32.xlu0 %v1293_v22 }
 0x50f   : > { %v1286_v24 = vpop.xlane.xlu1 %1285 }
 0x510   : > { %3454 = vrcp.f32 %v1286_v24 }
 0x51a   : > { %v3455_v25 = vpop.eup %3454 }
 0x51b   : > { %v1300_v26 = vmul.f32 %v3455_v25, %v3447_v4 }
 0x51d   : > { %v1304_v28 = vpack.c.bf16 %v1300_v26, %v1300_v26 }
 0x51f   : > { %3093 = vmatmul.mubr.msk.bf16.vlgmr.msra.gmra.mrb[4].mxu0 %vm1060_vm2, %v1304_v28 }
 0x520   : > { %3103 = vmatpush3.bf16.msra.mxu0 %v3402_v27  ;;  %3104 = vmatprep.mubr.msk.bf16.mxu0 %vm3929_vm1, %v3928_v5 }
 0x521   : > { %3114 = vmatprep.subr.bf16.mxu0 %v3928_v5 }
 0x582   : > { %v1289_v29 = vpop.xlane.xlu1 %1288 }
 0x583   : > { %3456 = vrcp.f32 %v1289_v29 }
 0x586   : > { %v1292_v30 = vpop.xlane.xlu1 %1291 }
 0x587   : > { %3458 = vrcp.f32 %v1292_v30  ;;  %v2910_v30 = vld [vmem:[%s5036_s23] ss:$0 sm:$0xff] }
 0x58a   : > { %v1295_v31 = vpop.xlane.xlu0 %1294 }
 0x58b   : > { %3460 = vrcp.f32 %v1295_v31 }
 0x58d   : > { %v3457_v32 = vpop.eup %3456 }
 0x58e   : > { %v1301_v33 = vmul.f32 %v3457_v32, %v3449_v17  ;;  %v2911_v32 = vld [vmem:[%s5037_s24] ss:$0 sm:$0xff]  ;;  %s2964_s24 = sshll.u32 %s5030_s18, 1 }
 0x590   : > { %v1305_v35 = vpack.c.bf16 %v1301_v33, %v1301_v33 }
 0x591   : > { %v3459_v36 = vpop.eup %3458 }
 0x592   : > { %v1302_v37 = vmul.f32 %v3459_v36, %v3451_v19  ;;  %3099 = vmatmul.mubr.msk.bf16.vlgmr.msra.gmra.mrb[16].mxu1 %vm1060_vm2, %v1305_v35  ;;  %v3409_v19 = vld [vmem:[#allocation13 + $0x8] sm:$0xff]   ;;  %v1741_v36 = vld [vmem:[%s4495_s7] sm:$0xf] }
 0x593   : > { %3109 = vmatpush3.bf16.msra.mxu1 %v3403_v34  ;;  %3110 = vmatprep.mubr.msk.bf16.mxu1 %vm3929_vm1, %v3928_v5 }
 0x594   : > { %v1306_v38 = vpack.c.bf16 %v1302_v37, %v1302_v37  ;;  %3126 = vmatprep.subr.bf16.mxu1 %v3928_v5  ;;  %v1757_v37 = vsel %vm1060_vm2, %v1741_v36, 0  ;;  %v1746_v36 = vld [vmem:[%s4501_s3 + $0x4] sm:$0xf] }
 0x595   : > { %v3461_v39 = vpop.eup %3460 }
 0x596   : > { %v1303_v40 = vmul.f32 %v3461_v39, %v3453_v21  ;;  %3105 = vmatmul.mubr.msk.bf16.vlgmr.msra.gmra.mrb[8].mxu0 %vm1060_vm2, %v1306_v38  ;;  %v1742_v38 = vld [vmem:[%s4495_s7 + $0x4] sm:$0xf] }
 0x597   : > { %3122 = vmatprep.mubr.msk.bf16.mxu0 %vm3929_vm1, %v3928_v5  ;;  %3115 = vmatpush3.bf16.msra.mxu0 %v3404_v47  ;;  %v1803_v39 = vsel %vm1060_vm2, %v1742_v38, 0  ;;  %v2037_v38 = vsel %vm1989_vm8, %v1746_v36, 0 }
 0x598   : > { %v1307_v41 = vpack.c.bf16 %v1303_v40, %v1303_v40  ;;  %3116 = vmatprep.subr.bf16.mxu0 %v3928_v5 }
 0x59a   : > { %3111 = vmatmul.mubr.msk.bf16.vlgmr.msra.gmra.mrb[20].mxu1 %vm1060_vm2, %v1307_v41 }
 0x59b   : > { %3134 = vmatprep.mubr.msk.bf16.mxu1 %vm3929_vm1, %v3928_v5  ;;  %3117 = vmatpush3.bf16.msra.mxu0 %v3405_v48 }
 0x59c   : > { %3118 = vmatprep.subr.bf16.mxu0 %v3928_v5  ;;  %3127 = vmatpush3.bf16.msra.mxu1 %v3408_v18 }
 0x59d   : > { %3128 = vmatprep.subr.bf16.mxu1 %v3928_v5 }
 0x59f   : > { %3119 = vmatpush3.bf16.msra.mxu0 %v3406_v49 }
 0x5a0   : > { %3120 = vmatprep.subr.bf16.mxu0 %v3928_v5  ;;  %3129 = vmatpush3.bf16.msra.mxu1 %v3409_v19 }
 0x5a1   : > { %3130 = vmatprep.subr.bf16.mxu1 %v3928_v5 }
 0x5a3   : > { %3121 = vmatpush3.bf16.msra.mxu0 %v3407_v50 }
 0x5a4   : > { %3138 = vmatprep.subr.bf16.mxu0 %v3928_v5 }
 0x5f2   : > { %v1351_v42 = vpop.f32.mrb[4].mxu0 }
 0x5f3   : > { %v1504_v43 = vpack.c.bf16 %v1351_v42, %v1351_v42  ;;  %v3094_v44 = vpop.f32.mrb[5].mxu0 }
 0x5f4   : > { %v1354_v45 = vpop.f32.mrb[6].mxu0 }
 0x5f5   : > { %1505 = vst.msk [vmem:[#allocation3] sm:$0xf] %vm1015_vm3, %v1504_v43  ;;  %v3095_v46 = vpop.f32.mrb[7].mxu0  ;;  %v1743_v45 = vld [vmem:[%s4495_s7 + $0x8] sm:$0xf] }
 0x5f6   : > { %v1849_v46 = vsel %vm1060_vm2, %v1743_v45, 0 }
 0x665   : > { %v1400_v51 = vpop.f32.mrb[16].mxu1 }
 0x666   : > { %v2973_v52 = vpack.c.bf16 %v1400_v51, %v1400_v51  ;;  %v3100_v53 = vpop.f32.mrb[17].mxu1  ;;  %v1744_v51 = vld [vmem:[%s4495_s7 + $0xc] sm:$0xf]  ;;  %s2618_s7 = sadd.s32 %s5041_s2, %s2964_s24 }
 0x667   : > { %v1403_v54 = vpop.f32.mrb[18].mxu1 }
 0x668   : > { %1510 = vrot.lane.b32.xlu1 %v2973_v52, %s3933_s8  ;;  %v3101_v55 = vpop.f32.mrb[19].mxu1  ;;  %v1895_v52 = vsel %vm1060_vm2, %v1744_v51, 0 }
 0x669   : > { %v1449_v56 = vpop.f32.mrb[8].mxu0 }
 0x66a   : > { %v2974_v57 = vpack.c.bf16 %v1449_v56, %v1449_v56  ;;  %v3106_v58 = vpop.f32.mrb[9].mxu0 }
 0x66b   : > { %v1452_v59 = vpop.f32.mrb[10].mxu0 }
 0x66c   : > { %1519 = vrot.lane.b32.xlu0 %v2974_v57, %s3934_s25  ;;  %v3107_v60 = vpop.f32.mrb[11].mxu0 }
 0x66d   : > { %v1498_v61 = vpop.f32.mrb[20].mxu1 }
 0x66e   : > { %v2975_v62 = vpack.c.bf16 %v1498_v61, %v1498_v61  ;;  %v3112_v63 = vpop.f32.mrb[21].mxu1 }
 0x66f   : > { %v1501_v1 = vpop.f32.mrb[22].mxu1 }
 0x670   : > { %1528 = vrot.lane.b32.xlu1 %v2975_v62, %s3935_s17  ;;  %v3113_v2 = vpop.f32.mrb[23].mxu1 }
 0x6da   : > { %v1511_v3 = vpop.permute.xlu1 %1510 }
 0x6db   : > { %1514 = vst.msk [vmem:[#allocation3] sm:$0xf] %vm1513_vm4, %v1511_v3 }
 0x6de   : > { %v1520_v4 = vpop.permute.xlu0 %1519 }
 0x6df   : > { %1523 = vst.msk [vmem:[#allocation3] sm:$0xf] %vm1522_vm5, %v1520_v4 }
 0x6e2   : > { %v1529_v6 = vpop.permute.xlu1 %1528 }
 0x6e3   : > { %1532 = vst.msk [vmem:[#allocation3] sm:$0xf] %vm1531_vm6, %v1529_v6 }
 0x6ea   : > { %v1533_v7 = vld [vmem:[#allocation3] sm:$0xf] }
 0x6eb   : > { %3123 = vmatmul.mubr.msk.bf16.vlgmr.msra.gmra.mrb[12].mxu0 %vm905_vm0, %v1533_v7 }
 0x6ec   : > { %3140 = vmatprep.mubr.msk.bf16.mxu0 %vm3929_vm1, %v3928_v5  ;;  %3139 = vmatpush3.bf16.xpose.msra.mxu0 %v1757_v37 }
 0x6ed   : > { %3150 = vmatprep.subr.bf16.mxu0 %v3928_v5 }
 0x7be   : > { %v1610_v9 = vpop.f32.mrb[12].mxu0 }
 0x7bf   : > { %v1611_v10 = vadd.f32 %v2904_v8, %v1610_v9  ;;  %v3124_v11 = vpop.f32.mrb[13].mxu0 }
 0x7c0   : > { %v1613_v12 = vpop.f32.mrb[14].mxu0 }
 0x7c1   : > { %v4642_v13 = vadd.f32 %v1611_v10, %v4519_v0  ;;  %v3125_v14 = vpop.f32.mrb[15].mxu0  ;;  %v3410_v0 = vld [vmem:[#allocation13 + $0x10] sm:$0xff]  }
 0x7c2   : > { %3131 = vmatpush3.bf16.msra.mxu1 %v3410_v0  ;;  %v1745_v0 = vld [vmem:[%s4501_s3] sm:$0xf] }
 0x7c3   : > { %v1617_v15 = vsel %vm905_vm0, %v4642_v13, 0.0  ;;  %v1621_v16 = vmul.f32 %v4642_v13, %v4642_v13  ;;  %3132 = vmatprep.subr.bf16.mxu1 %v3928_v5 }
 0x7c4   : > { %1618 = vadd.xlane.f32.xlu1 %v1617_v15 }
 0x7c5   : > { %v1622_v17 = vsel %vm905_vm0, %v1621_v16, 0.0 }
 0x7c6   : > { %1623 = vadd.xlane.f32.xlu0 %v1622_v17  ;;  %3133 = vmatpush3.bf16.msra.mxu1 %v3411_v20  ;;  %v1991_v20 = vsel %vm1989_vm8, %v1745_v0, 0 }
 0x7c7   : > { %3144 = vmatprep.subr.bf16.mxu1 %v3928_v5 }
 0x851   : > { %v1619_v21 = vpop.xlane.xlu1 %1618 }
 0x852   : > { %v1620_v22 = vmul.f32 0.015625, %v1619_v21 }
 0x853   : > { %v1624_v23 = vpop.xlane.xlu0 %1623 }
 0x854   : > { %v1626_v24 = vmul.f32 %v1620_v22, %v1620_v22  ;;  %v1625_v25 = vmul.f32 0.015625, %v1624_v23  ;;  %v1628_v28 = vsub.f32 %v4642_v13, %v1620_v22 }
 0x856   : > { %v1627_v26 = vsub.f32 %v1625_v25, %v1626_v24 }
 0x858   : > { %v1629_v27 = vadd.f32 1e-05, %v1627_v26 }
 0x85a   : > { %3462 = vrsqrt.f32 %v1629_v27 }
 0x864   : > { %v3463_v29 = vpop.eup %3462 }
 0x865   : > { %v1631_v31 = vmul.f32 %v3463_v29, %v1628_v28 }
 0x867   : > { %v1639_v33 = vmul.f32 %v2910_v30, %v1631_v31 }
 0x869   : > { %v1647_v34 = vadd.f32 %v2911_v32, %v1639_v33 }
 0x86b   : > { %v1648_v35 = vpack.c.bf16 %v1647_v34, %v1647_v34 }
 0x86d   : > { %3135 = vmatmul.mubr.msk.bf16.vlgmr.msra.gmra.mrb[24].mxu1 %vm905_vm0, %v1648_v35 }
 0x86e   : > { %3146 = vmatprep.mubr.msk.bf16.mxu1 %vm3929_vm1, %v3928_v5  ;;  %3145 = vmatpush3.bf16.xpose.msra.mxu1 %v1803_v39 }
 0x86f   : > { %3156 = vmatprep.subr.bf16.mxu1 %v3928_v5 }
 0x940   : > { %v1718_v40 = vpop.f32.mrb[24].mxu1 }
 0x941   : > { %v1724_v41 = vpack.c.bf16 %v1718_v40, %v1718_v40  ;;  %v3136_v42 = vpop.f32.mrb[25].mxu1  ;;  %v1747_v40 = vld [vmem:[%s4501_s3 + $0x8] sm:$0xf] }
 0x942   : > { %v1721_v43 = vpop.f32.mrb[26].mxu1 }
 0x943   : > { %1725 = vst.msk [vmem:[#allocation2] sm:$0xf] %vm1015_vm3, %v1724_v41  ;;  %1733 = vrot.lane.b32.xlu1 %v1724_v41, %s3932_s0  ;;  %1729 = vrot.lane.b32.xlu0 %v1724_v41, %s3931_s20  ;;  %v3137_v44 = vpop.f32.mrb[27].mxu1  ;;  %v2083_v43 = vsel %vm1989_vm8, %v1747_v40, 0  ;;  %v3936_v40 = vmov 0   ;;  %s5042_s0 = sld [smem:[#allocation58_spill]] }
 0x947   : > { %1737 = vrot.lane.b32.xlu1 %v1724_v41, %s3930_s11  ;;  %s5038_s11 = sld [smem:[#allocation55_spill]] }
 0x94a   : > { %v1749_v47 = vld [vmem:[#allocation2] sm:$0xf] }
 0x94b   : > { %3141 = vmatmul.mubr.msk.bf16.vlgmr.msra.gmra.mrb[16].mxu0 %vm1060_vm2, %v1749_v47 }
 0x94c   : > { %3151 = vmatpush3.bf16.xpose.msra.mxu0 %v1849_v46  ;;  %3152 = vmatprep.mubr.msk.bf16.mxu0 %vm3929_vm1, %v3928_v5 }
 0x94d   : > { %3162 = vmatprep.subr.bf16.mxu0 %v3928_v5  ;;  %v3424_v36 = vld [vmem:[%s5038_s11 + $0x24] ss:$8 sps:$4 sm:$0xff]  }
 0x9b5   : > { %v1734_v48 = vpop.permute.xlu1 %1733  ;;  %v1730_v49 = vpop.permute.xlu0 %1729 }
 0x9b6   : > { %1736 = vst.msk [vmem:[#allocation2 + $0x8] sm:$0xf] %vm1015_vm3, %v1734_v48  ;;  %1732 = vst.msk [vmem:[#allocation2 + $0x4] sm:$0xf] %vm1015_vm3, %v1730_v49 }
 0x9b9   : > { %v1738_v50 = vpop.permute.xlu1 %1737 }
 0x9ba   : > { %1740 = vst.msk [vmem:[#allocation2 + $0xc] sm:$0xf] %vm1015_vm3, %v1738_v50  ;;  %v1748_v50 = vld [vmem:[%s4501_s3 + $0xc] sm:$0xf] }
 0x9bd   : > { %v1750_v53 = vld [vmem:[#allocation2 + $0x4] sm:$0xf]  ;;  %v1751_v54 = vld [vmem:[#allocation2 + $0x8] sm:$0xf] }
 0x9be   : > { %3147 = vmatmul.mubr.msk.bf16.vlgmr.msra.gmra.mrb[28].mxu1 %vm1060_vm2, %v1750_v53  ;;  %3153 = vmatmul.mubr.msk.bf16.vlgmr.msra.gmra.mrb[20].mxu0 %vm1060_vm2, %v1751_v54  ;;  %v2129_v54 = vsel %vm1989_vm8, %v1748_v50, 0 }
 0x9bf   : > { %3157 = vmatpush3.bf16.xpose.msra.mxu1 %v1895_v52  ;;  %3158 = vmatprep.mubr.msk.bf16.mxu1 %vm3929_vm1, %v3928_v5 }
 0x9c0   : > { %3164 = vmatprep.mubr.msk.bf16.mxu0 %vm3929_vm1, %v3928_v5  ;;  %3168 = vmatprep.subr.bf16.mxu1 %v3928_v5 }
 0x9c1   : > { %v1752_v55 = vld [vmem:[#allocation2 + $0xc] sm:$0xf]  ;;  %3163 = vmatpush3.bf16.msra.mxu0 %v1991_v20 }
 0x9c2   : > { %3174 = vmatprep.subr.bf16.mxu0 %v3928_v5 }
 0x9c6   : > { %3159 = vmatmul.mubr.msk.bf16.vlgmr.msra.gmra.mrb[32].mxu1 %vm1060_vm2, %v1752_v55 }
 0x9c7   : > { %3170 = vmatprep.mubr.msk.bf16.mxu1 %vm3929_vm1, %v3928_v5  ;;  %3169 = vmatpush3.bf16.msra.mxu1 %v2037_v38  ;;  %v3427_v38 = vld [vmem:[%s5038_s11 + $0x34] ss:$8 sps:$4 sm:$0xff]  }
 0x9c8   : > { %3180 = vmatprep.subr.bf16.mxu1 %v3928_v5 }
 0xa1e   : > { %v1793_v56 = vpop.f32.mrb[16].mxu0 }
 0xa1f   : > { %v3142_v57 = vpop.f32.mrb[17].mxu0  ;;  %v1938_v58 = vsel %vm1937_vm7, %v1793_v56, -inf }
 0xa20   : > { %1939 = vmax.xlane.f32.xlu0 %v1938_v58  ;;  %v1796_v59 = vpop.f32.mrb[18].mxu0 }
 0xa21   : > { %v3143_v60 = vpop.f32.mrb[19].mxu0 }
 0xa91   : > { %v1839_v61 = vpop.f32.mrb[28].mxu1  ;;  %v1885_v62 = vpop.f32.mrb[20].mxu0 }
 0xa92   : > { %v3148_v63 = vpop.f32.mrb[29].mxu1  ;;  %v3154_v1 = vpop.f32.mrb[21].mxu0  ;;  %v1944_v2 = vsel %vm1937_vm7, %v1885_v62, -inf  ;;  %v1941_v3 = vsel %vm1937_vm7, %v1839_v61, -inf }
 0xa93   : > { %1945 = vmax.xlane.f32.xlu0 %v1944_v2  ;;  %v1888_v4 = vpop.f32.mrb[22].mxu0  ;;  %1942 = vmax.xlane.f32.xlu1 %v1941_v3  ;;  %v1842_v6 = vpop.f32.mrb[30].mxu1  ;;  %v3412_v63 = vld [vmem:[#allocation15] sm:$0xff]   ;;  %v3413_v1 = vld [vmem:[#allocation15 + $0x8] sm:$0xff]   ;;  %v3414_v2 = vld [vmem:[#allocation15 + $0x10] sm:$0xff]  }
 0xa94   : > { %v3149_v7 = vpop.f32.mrb[31].mxu1  ;;  %v3155_v8 = vpop.f32.mrb[23].mxu0  ;;  %v3415_v4 = vld [vmem:[#allocation15 + $0x18] sm:$0xff]  }
 0xa99   : > { %v1931_v9 = vpop.f32.mrb[32].mxu1 }
 0xa9a   : > { %v3160_v10 = vpop.f32.mrb[33].mxu1  ;;  %v1947_v11 = vsel %vm1937_vm7, %v1931_v9, -inf }
 0xa9b   : > { %1948 = vmax.xlane.f32.xlu0 %v1947_v11  ;;  %v1934_v12 = vpop.f32.mrb[34].mxu1 }
 0xa9c   : > { %v3161_v14 = vpop.f32.mrb[35].mxu1 }
 0xaad   : > { %v1940_v15 = vpop.xlane.xlu0 %1939 }
 0xaae   : > { %v1950_v16 = vsub.f32 %v1793_v56, %v1940_v15 }
 0xab0   : > { %v1954_v17 = vmul.f32 1.442695, %v1950_v16 }
 0xab2   : > { %3464 = vpow2.f32 %v1954_v17 }
 0xabc   : > { %v3465_v18 = vpop.eup %3464 }
 0xabd   : > { %v1962_v19 = vsel %vm1937_vm7, %v3465_v18, 0.0 }
 0xabe   : > { %1963 = vadd.xlane.f32.xlu1 %v1962_v19 }
 0xb20   : > { %v1946_v21 = vpop.xlane.xlu0 %1945  ;;  %v1943_v22 = vpop.xlane.xlu1 %1942 }
 0xb21   : > { %v1952_v23 = vsub.f32 %v1885_v62, %v1946_v21  ;;  %v1951_v24 = vsub.f32 %v1839_v61, %v1943_v22 }
 0xb23   : > { %v1958_v25 = vmul.f32 1.442695, %v1952_v23  ;;  %v1956_v26 = vmul.f32 1.442695, %v1951_v24  ;;  %v2929_v23 = vld [vmem:[#allocation16] ss:$0 sm:$0xff] }
 0xb25   : > { %3466 = vpow2.f32 %v1958_v25 }
 0xb26   : > { %3468 = vpow2.f32 %v1956_v26 }
 0xb28   : > { %v1949_v27 = vpop.xlane.xlu0 %1948 }
 0xb29   : > { %v1953_v28 = vsub.f32 %v1931_v9, %v1949_v27 }
 0xb2b   : > { %v1960_v29 = vmul.f32 1.442695, %v1953_v28 }
 0xb2d   : > { %3470 = vpow2.f32 %v1960_v29 }
 0xb2f   : > { %v3467_v30 = vpop.eup %3466 }
 0xb30   : > { %v3469_v31 = vpop.eup %3468  ;;  %v1968_v32 = vsel %vm1937_vm7, %v3467_v30, 0.0 }
 0xb31   : > { %1969 = vadd.xlane.f32.xlu1 %v1968_v32  ;;  %v1965_v33 = vsel %vm1937_vm7, %v3469_v31, 0.0 }
 0xb32   : > { %1966 = vadd.xlane.f32.xlu0 %v1965_v33  ;;  %v3418_v33 = vld [vmem:[%s5038_s11 + $0x4] ss:$8 sps:$4 sm:$0xff]  }
 0xb37   : > { %v3471_v34 = vpop.eup %3470 }
 0xb38   : > { %v1971_v35 = vsel %vm1937_vm7, %v3471_v34, 0.0 }
 0xb39   : > { %1972 = vadd.xlane.f32.xlu0 %v1971_v35  ;;  %v3419_v35 = vld [vmem:[%s5038_s11 + $0x10] ss:$8 sps:$4 sm:$0xff]  }
 0xb4b   : > { %v1964_v37 = vpop.xlane.xlu1 %1963 }
 0xb4c   : > { %3472 = vrcp.f32 %v1964_v37  ;;  %v3422_v37 = vld [vmem:[%s5038_s11 + $0x20] ss:$8 sps:$4 sm:$0xff]  }
 0xb56   : > { %v3473_v39 = vpop.eup %3472 }
 0xb57   : > { %v1978_v41 = vmul.f32 %v3473_v39, %v3465_v18  ;;  %v3425_v39 = vld [vmem:[%s5038_s11 + $0x30] ss:$8 sps:$4 sm:$0xff]  }
 0xb59   : > { %v1982_v42 = vpack.c.bf16 %v1978_v41, %v1978_v41 }
 0xb5b   : > { %3165 = vmatmul.mubr.msk.bf16.vlgmr.msra.gmra.mrb[24].mxu0 %vm1937_vm7, %v1982_v42 }
 0xb5c   : > { %3175 = vmatpush3.bf16.msra.mxu0 %v2083_v43  ;;  %3176 = vmatprep.mubr.msk.bf16.mxu0 %vm3929_vm1, %v3928_v5 }
 0xb5d   : > { %3186 = vmatprep.subr.bf16.mxu0 %v3928_v5 }
 0xbbe   : > { %v1970_v44 = vpop.xlane.xlu1 %1969 }
 0xbbf   : > { %3474 = vrcp.f32 %v1970_v44  ;;  %v1967_v45 = vpop.xlane.xlu0 %1966 }
 0xbc0   : > { %3476 = vrcp.f32 %v1967_v45 }
 0xbc6   : > { %v1973_v46 = vpop.xlane.xlu0 %1972 }
 0xbc7   : > { %3478 = vrcp.f32 %v1973_v46 }
 0xbc9   : > { %v3475_v47 = vpop.eup %3474 }
 0xbca   : > { %v3477_v48 = vpop.eup %3476  ;;  %v1980_v49 = vmul.f32 %v3475_v47, %v3467_v30 }
 0xbcb   : > { %v1979_v51 = vmul.f32 %v3477_v48, %v3469_v31 }
 0xbcc   : > { %v1984_v52 = vpack.c.bf16 %v1980_v49, %v1980_v49 }
 0xbcd   : > { %v1983_v53 = vpack.c.bf16 %v1979_v51, %v1979_v51 }
 0xbce   : > { %3177 = vmatmul.mubr.msk.bf16.vlgmr.msra.gmra.mrb[28].mxu0 %vm1937_vm7, %v1984_v52 }
 0xbcf   : > { %3171 = vmatmul.mubr.msk.bf16.vlgmr.msra.gmra.mrb[36].mxu1 %vm1937_vm7, %v1983_v53  ;;  %3194 = vmatprep.mubr.msk.bf16.mxu0 %vm3929_vm1, %v3928_v5 }
 0xbd0   : > { %3181 = vmatpush3.bf16.msra.mxu1 %v2129_v54  ;;  %3182 = vmatprep.mubr.msk.bf16.mxu1 %vm3929_vm1, %v3928_v5  ;;  %v2935_v54 = vld [vmem:[#allocation18] ss:$0 sm:$0xff] }
 0xbd1   : > { %v3479_v55 = vpop.eup %3478  ;;  %3187 = vmatpush3.bf16.msra.mxu0 %v3412_v63  ;;  %2376 = vmatprep.subr.bf16.mxu1 %v3418_v33 }
 0xbd2   : > { %v1981_v56 = vmul.f32 %v3479_v55, %v3471_v34  ;;  %3188 = vmatprep.subr.bf16.mxu0 %v3928_v5  ;;  %v3421_v34 = vld [vmem:[%s5038_s11 + $0x14] ss:$8 sps:$4 sm:$0xff]  }
 0xbd4   : > { %v1985_v57 = vpack.c.bf16 %v1981_v56, %v1981_v56  ;;  %v2936_v56 = vld [vmem:[#allocation19] ss:$0 sm:$0xff] }
 0xbd5   : > { %3189 = vmatpush3.bf16.msra.mxu0 %v3413_v1 }
 0xbd6   : > { %3190 = vmatprep.subr.bf16.mxu0 %v3928_v5 }
 0xbd7   : > { %3183 = vmatmul.mubr.msk.bf16.vlgmr.msra.gmra.mrb[40].mxu1 %vm1937_vm7, %v1985_v57 }
 0xbd8   : > { %2408 = vmatprep.mubr.bf16.mxu1 %v3936_v40 }
 0xbd9   : > { %3191 = vmatpush3.bf16.msra.mxu0 %v3414_v2 }
 0xbda   : > { %3192 = vmatprep.subr.bf16.mxu0 %v3928_v5 }
 0xbdd   : > { %3193 = vmatpush3.bf16.msra.mxu0 %v3415_v4 }
 0xc2e   : > { %v2027_v58 = vpop.f32.mrb[24].mxu0 }
 0xc2f   : > { %v2171_v59 = vpack.c.bf16 %v2027_v58, %v2027_v58  ;;  %v3166_v60 = vpop.f32.mrb[25].mxu0 }
 0xc30   : > { %v2030_v61 = vpop.f32.mrb[26].mxu0 }
 0xc31   : > { %2172 = vst.msk [vmem:[#allocation3] sm:$0xf] %vm1015_vm3, %v2171_v59  ;;  %v3167_v62 = vpop.f32.mrb[27].mxu0 }
 0xca1   : > { %v2119_v3 = vpop.f32.mrb[28].mxu0 }
 0xca2   : > { %v2073_v6 = vpop.f32.mrb[36].mxu1  ;;  %v2978_v7 = vpack.c.bf16 %v2119_v3, %v2119_v3  ;;  %v3178_v8 = vpop.f32.mrb[29].mxu0 }
 0xca3   : > { %v2977_v9 = vpack.c.bf16 %v2073_v6, %v2073_v6  ;;  %v3172_v10 = vpop.f32.mrb[37].mxu1  ;;  %v2122_v11 = vpop.f32.mrb[30].mxu0 }
 0xca4   : > { %v2076_v12 = vpop.f32.mrb[38].mxu1  ;;  %v3179_v14 = vpop.f32.mrb[31].mxu0  ;;  %2185 = vrot.lane.b32.xlu0 %v2978_v7, %s3934_s25  ;;  %v2323_v10 = vlaneseq  ;;  %s2965_s25 = sshll.u32 %s2618_s7, 7 }
 0xca5   : > { %2177 = vrot.lane.b32.xlu1 %v2977_v9, %s3933_s8  ;;  %v3173_v15 = vpop.f32.mrb[39].mxu1  ;;  %s5039_s8 = sld [smem:[#allocation57_spill]]  ;;  %v2321_v14 = vld [vmem:[%s5040_s15] sm:$0x3]  ;;  %s4830_s23 = scalar_lea.hbm %s5043_s9, %s2965_s25 }
 0xca6   : > { %v2324_v11 = vshrl.u32 %v2323_v10, 7  ;;  %s2607_s15 = scalar_lea.sflag [#allocation6], %s4483_s6 }
 0xca8   : > { %v2325_v12 = vsub.s32 0, %v2324_v11  ;;  %v2329_v15 = vsub.s32 1, %v2324_v11 }
 0xcaa   : > { %v2165_v16 = vpop.f32.mrb[40].mxu1 }
 0xcab   : > { %v2979_v17 = vpack.c.bf16 %v2165_v16, %v2165_v16  ;;  %v3184_v18 = vpop.f32.mrb[41].mxu1  ;;  %v3428_v41 = vld [vmem:[%s5039_s8 + $0x40] sm:$0xff]   ;;  %v3430_v43 = vld [vmem:[%s5039_s8 + $0x48] sm:$0xff]   ;;  %v3432_v60 = vld [vmem:[%s5039_s8 + $0x50] sm:$0xff]   ;;  %v2326_v16 = vrot.slane %v2321_v14, %v2325_v12 }
 0xcac   : > { %v2168_v19 = vpop.f32.mrb[42].mxu1  ;;  %v3429_v42 = vld [vmem:[%s5039_s8] sm:$0xff]   ;;  %3032 = vmatprep.subr.bf16.mxu0 %v3428_v41  ;;  %v3431_v44 = vld [vmem:[%s5039_s8 + $0x8] sm:$0xff]   ;;  %v3433_v61 = vld [vmem:[%s5039_s8 + $0x10] sm:$0xff]  }
 0xcad   : > { %2193 = vrot.lane.b32.xlu1 %v2979_v17, %s3935_s17  ;;  %v3185_v0 = vpop.f32.mrb[43].mxu1  ;;  %v3434_v62 = vld [vmem:[%s5039_s8 + $0x58] sm:$0xff]   ;;  %v3436_v1 = vld [vmem:[%s5039_s8 + $0x60] sm:$0xff]   ;;  %v3438_v3 = vld [vmem:[%s5039_s8 + $0x68] sm:$0xff]   ;;  %v2330_v17 = vrot.slane %v2321_v14, %v2329_v15  ;;  %s892_s17 = scalar_lea.vmem [#allocation21], %s2862_s13  ;;  %s3937_s13 = smov [#allocation21]  }
 0xcae   : > { %v3435_v63 = vld [vmem:[%s5039_s8 + $0x18] sm:$0xff]   ;;  %v3437_v2 = vld [vmem:[%s5039_s8 + $0x20] sm:$0xff]   ;;  %v3439_v4 = vld [vmem:[%s5039_s8 + $0x28] sm:$0xff]   ;;  %s2622_s27 = sshll.u32 %s892_s17, 4  ;;  %s3776_s24 = sshll.u32 %s3937_s13, 4  ;;  %s4832_s27 = int_to_ptr.vmem [resolvable:$true] %s2622_s27  ;;  %s3777_s24 = int_to_ptr.vmem [resolvable:$false] %s3776_s24 }
 0xcaf   : > { %v3440_v6 = vld [vmem:[%s5039_s8 + $0x70] sm:$0xff]   ;;  %v3442_v8 = vld [vmem:[%s5039_s8 + $0x78] sm:$0xff]   ;;  %s3772_s2 = scalar_lea.vmem %s4832_s27, 128  ;;  %s3778_s7 = scalar_lea.vmem %s3777_s24, 256 }
 0xcb0   : > { %v3441_v7 = vld [vmem:[%s5039_s8 + $0x30] sm:$0xff]   ;;  %v3443_v9 = vld [vmem:[%s5039_s8 + $0x38] sm:$0xff]   ;;  %p3773_p13 = scmp.ne.s32.totalorder %s4832_s27, %s3772_s2  ;;  %p3779_p5 = scmp.lt.s32.totalorder %s4832_s27, %s3777_s24 }
 0xcb1   : > { %p3780_p4 = scmp.lt.s32.totalorder %s3778_s7, %s3772_s2 }
 0xcb2   : > { %p3774_p0 = pnand %p3773_p13, %p5044_p7 }
 0xcb3   : > { %p3781_p8 = por %p3780_p4, %p3779_p5 }
 0xcb4   : > { %p3775_p10 = pneg %p3774_p0 }
 0xcb6   : > { %p3782_p1 = pnand %p3781_p8, %p3775_p10 }
 0xd16   : > { %v2186_v20 = vpop.permute.xlu0 %2185 }
 0xd17   : > { %v2178_v5 = vpop.permute.xlu1 %2177 }
 0xd18   : > { %2180 = vst.msk [vmem:[#allocation3] sm:$0xf] %vm1513_vm4, %v2178_v5 }
 0xd19   : > { %2188 = vst.msk [vmem:[#allocation3] sm:$0xf] %vm1522_vm5, %v2186_v20 }
 0xd1f   : > { %v2194_v21 = vpop.permute.xlu1 %2193 }
 0xd20   : > { %2196 = vst.msk [vmem:[#allocation3] sm:$0xf] %vm1531_vm6, %v2194_v21 }
 0xd27   : > { %v2197_v22 = vld [vmem:[#allocation3] sm:$0xf] }
 0xd28   : > { %3195 = vmatmul.mubr.msk.bf16.vlgmr.msra.gmra.mrb[32].mxu0 %vm905_vm0, %v2197_v22 }
 0xd29   : > { %3033 = vmatpush3.bf16.msra.mxu0 %v3429_v42 }
 0xd2a   : > { %3034 = vmatprep.subr.bf16.mxu0 %v3430_v43 }
 0xd2d   : > { %3035 = vmatpush3.bf16.msra.mxu0 %v3431_v44 }
 0xd2e   : > { %3036 = vmatprep.subr.bf16.mxu0 %v3432_v60 }
 0xd31   : > { %3037 = vmatpush3.bf16.msra.mxu0 %v3433_v61 }
 0xd32   : > { %3038 = vmatprep.subr.bf16.mxu0 %v3434_v62 }
 0xd35   : > { %3039 = vmatpush3.bf16.msra.mxu0 %v3435_v63 }
 0xd36   : > { %3040 = vmatprep.subr.bf16.mxu0 %v3436_v1 }
 0xd39   : > { %3041 = vmatpush3.bf16.msra.mxu0 %v3437_v2 }
 0xd3a   : > { %3042 = vmatprep.subr.bf16.mxu0 %v3438_v3 }
 0xd3d   : > { %3043 = vmatpush3.bf16.msra.mxu0 %v3439_v4 }
 0xd3e   : > { %3044 = vmatprep.subr.bf16.mxu0 %v3440_v6 }
 0xd41   : > { %3045 = vmatpush3.bf16.msra.mxu0 %v3441_v7 }
 0xd42   : > { %3046 = vmatprep.subr.bf16.mxu0 %v3442_v8 }
 0xd45   : > { %3047 = vmatpush3.bf16.msra.mxu0 %v3443_v9 }
 0xdfb   : > { %v2274_v24 = vpop.f32.mrb[32].mxu0 }
 0xdfc   : > { %v2275_v25 = vadd.f32 %v2929_v23, %v2274_v24  ;;  %v3196_v26 = vpop.f32.mrb[33].mxu0 }
 0xdfd   : > { %v2277_v27 = vpop.f32.mrb[34].mxu0 }
 0xdfe   : > { %v4735_v28 = vadd.f32 %v2275_v25, %v4642_v13  ;;  %v3197_v29 = vpop.f32.mrb[35].mxu0  ;;  %v3416_v13 = vld [vmem:[%s5038_s11] ss:$8 sps:$4 sm:$0xff]  }
 0xdff   : > { %2377 = vmatpush1.bf16.msra.mxu1 %v3416_v13 }
 0xe00   : > { %v2281_v30 = vsel %vm905_vm0, %v4735_v28, 0.0  ;;  %v2285_v31 = vmul.f32 %v4735_v28, %v4735_v28  ;;  %2378 = vmatprep.subr.bf16.mxu1 %v3421_v34 }
 0xe01   : > { %2282 = vadd.xlane.f32.xlu1 %v2281_v30 }
 0xe02   : > { %v2286_v32 = vsel %vm905_vm0, %v2285_v31, 0.0 }
 0xe03   : > { %2287 = vadd.xlane.f32.xlu0 %v2286_v32  ;;  %2379 = vmatpush1.bf16.msra.mxu1 %v3419_v35  ;;  %v2946_v35 = vld [vmem:[%s5042_s0] ss:$0 sm:$0xff] }
 0xe04   : > { %2380 = vmatprep.subr.bf16.mxu1 %v3424_v36 }
 0xe07   : > { %2381 = vmatpush1.bf16.msra.mxu1 %v3422_v37 }
 0xe08   : > { %2382 = vmatprep.subr.bf16.mxu1 %v3427_v38 }
 0xe0b   : > { %2383 = vmatpush1.bf16.msra.mxu1 %v3425_v39 }
 0xe8e   : > { %v2283_v45 = vpop.xlane.xlu1 %2282 }
 0xe8f   : > { %v2284_v46 = vmul.f32 0.015625, %v2283_v45 }
 0xe90   : > { %v2288_v47 = vpop.xlane.xlu0 %2287 }
 0xe91   : > { %v2290_v48 = vmul.f32 %v2284_v46, %v2284_v46  ;;  %v2289_v49 = vmul.f32 0.015625, %v2288_v47  ;;  %v2292_v52 = vsub.f32 %v4735_v28, %v2284_v46 }
 0xe93   : > { %v2291_v50 = vsub.f32 %v2289_v49, %v2290_v48 }
 0xe95   : > { %v2293_v51 = vadd.f32 1e-05, %v2291_v50 }
 0xe97   : > { %3480 = vrsqrt.f32 %v2293_v51 }
 0xea1   : > { %v3481_v53 = vpop.eup %3480 }
 0xea2   : > { %v2295_v55 = vmul.f32 %v3481_v53, %v2292_v52 }
 0xea4   : > { %v2303_v57 = vmul.f32 %v2935_v54, %v2295_v55 }
 0xea6   : > { %v2311_v58 = vadd.f32 %v2936_v56, %v2303_v57 }
 0xea8   : > { %v2312_v59 = vpack.c.bf16 %v2311_v58, %v2311_v58 }
 0xeaa   : > { %2945 = vmatmul.mubr.msk.bf16.vlgmr.msra.gmra.mrb[44].mxu1 %vm905_vm0, %v2312_v59 }
 0xf7d   : > { %v2410_v18 = vpop.f32.mrb[44].mxu1 }
 0xf7e   : > { %v2411_v19 = vadd.f32 %v2410_v18, %v2326_v16  ;;  %v2412_v0 = vpop.f32.mrb[45].mxu1 }
 0xf7f   : > { %v2413_v20 = vadd.f32 %v2412_v0, %v2330_v17  ;;  %v2414_v5 = vpop.f32.mrb[46].mxu1 }
 0xf80   : > { %v2419_v21 = vmul.f32 0.70710677, %v2411_v19  ;;  %v2415_v22 = vpop.f32.mrb[47].mxu1  ;;  %v2417_v26 = vmul.f32 0.5, %v2411_v19 }
 0xf81   : > { %v2420_v23 = vmul.f32 0.70710677, %v2413_v20  ;;  %v2418_v29 = vmul.f32 0.5, %v2413_v20 }
 0xf82   : > { %3482 = verf.f32 %v2419_v21 }
 0xf83   : > { %3484 = verf.f32 %v2420_v23 }
 0xf8c   : > { %v3483_v24 = vpop.eup %3482 }
 0xf8d   : > { %v3485_v25 = vpop.eup %3484  ;;  %v2423_v27 = vadd.f32 1.0, %v3483_v24 }
 0xf8e   : > { %v2424_v30 = vadd.f32 1.0, %v3485_v25 }
 0xf8f   : > { %v2425_v31 = vmul.f32 %v2423_v27, %v2417_v26 }
 0xf90   : > { %v2426_v32 = vmul.f32 %v2424_v30, %v2418_v29 }
 0xf91   : > { %v2427_v13 = vpack.c.bf16 %v2425_v31, %v2425_v31 }
 0xf92   : > { %v2428_v33 = vpack.c.bf16 %v2426_v32, %v2426_v32 }
 0xf94   : > { %2596 = vmatprep.mubr.bf16.mxu0 %v2428_v33 }
 0xf95   : > { %2597 = vmatmul.mubr.bf16.vlgmr.msra.gmra.mrb[36].mxu0 %v2427_v13 }
0x1068   : > { %v3048_v34 = vpop.f32.mrb[36].mxu0 }
0x1069   : > { %v3049_v36 = vpop.f32.mrb[37].mxu0 }
0x106a   : > { %v3050_v37 = vadd.f32 %v3049_v36, %v3048_v34  ;;  %v3051_v38 = vpop.f32.mrb[38].mxu0 }
0x106b   : > { %v3052_v39 = vpop.f32.mrb[39].mxu0 }
0x106c   : > { %v2599_v40 = vadd.f32 %v3050_v37, %v2946_v35 }
0x106e   : > { %v2604_v41 = vadd.f32 %v2599_v40, %v4735_v28 }
0x1070   : > { %2605 = vst.msk [vmem:[%s892_s17] sm:$0xff] %vm905_vm0, %v2604_v41 }
0x1071   : > { %3785 = shalt.err (!%p3782_p1)
}
0x1072   : > { %s3786_s6 = scalar_lea.hbm %s4830_s23, 128  ;;  %s3790_s0 = scalar_lea.hbm %s5043_s9, 512 }
0x1073   : > { %p3787_p12 = scmp.ne.s32.totalorder %s4830_s23, %s3786_s6  ;;  %p3791_p11 = scmp.lt.u32.totalorder %s4830_s23, %s5043_s9 }
0x1074   : > { %p3792_p2 = scmp.lt.u32.totalorder %s3790_s0, %s3786_s6  ;;  %p3794_p13 = scmp.lt.u32.totalorder %s3786_s6, %s4830_s23 }
0x1075   : > { %p3788_p6 = pnand %p3787_p12, %p5044_p7 }
0x1076   : > { %p3793_p3 = por %p3792_p2, %p3791_p11 }
0x1077   : > { %p3789_p9 = pneg %p3788_p6 }
0x1078   : > { %p3795_p0 = por %p3794_p13, %p3793_p3 }
0x107a   : > { %p3796_p10 = pnand %p3795_p0, %p3789_p9 }
0x107c   : > { %3799 = shalt.err (!%p3796_p10)
}
0x107d   : > { %3232 = dma.vmem_to_hbm [thread:$0]  (%p5044_p7), %s4832_s27, 128, %s4830_s23, %s2607_s15  }
0x107e PF: > { %s5045_s18 = sld [smem:[#allocation30_spill]]  ;;  %p3285_p5 = scmp.ge.s32.totalorder %s3914_s5, 2 }
0x107f   : > { %p5046_p4 = scmp.ne.s32.totalorder %s5005_s29, 0 }
0x1081   : > { %p3267_p8 = pnand %p3285_p5, %p5046_p4 }
0x1084   : > { %s2634_s14 = sand.u32 1, %s5045_s18  }
0x1085   : > { %s2635_s2 = scalar_lea.sflag [#allocation6], %s2634_s14 }
0x1086   : > { %3869 = dma.done.wait (!%p3267_p8), %s2635_s2, 128  }
0x1087   : > { %3871 = vsyncadd (!%p3267_p8), %s2635_s2, 4294967168  ;;  %s44_s5 = sadd.s32 1, %s3914_s5   ;;  %s5047_s2 = sld [smem:[#allocation29_spill]] }
0x1088   : > { %p41_p1 = scmp.ge.s32.totalorder %s44_s5, 6   ;;  %s5048_s27 = sld [smem:[#allocation31_spill]] }
0x1089   : > { %s5049_s25 = smov %s3882_s26  ;;  %s5050_s26 = smov %s4398_s1 }
0x108a   : > { %s5051_s3 = smov %s3894_s28  ;;  %s5052_s28 = smov %s4401_s12 }
0x108b   : > { %s5053_s29 = smov %s3906_s4  ;;  %s5054_s0 = smov %s3910_s30 }
0x108c   : > { %s5055_s4 = smov %s5058_s21  ;;  %s5056_s30 = smov %s5062_s22 }
0x108d   :  { %43 = sbr.rel (!%p41_p1) target bundleno = 38 (0x26), region = 210 }
0x1094   :  { %2640 = vsyncpa [#allocation5], 1 }
0x1095   :  { %2642 = vsyncpa [#allocation5 + $0x1], 1 }
0x1096   :  { %2643 = vsyncpa [#allocation8], 1 }
0x1097   :  { %2645 = vsyncpa [#allocation8 + $0x1], 1 }
0x1098   :  { %2646 = vsyncpa [#allocation11], 1 }
0x1099   :  { %2647 = vsyncpa [#allocation14], 1 }
0x109a   :  { %2648 = vsyncpa [#allocation17], 1 }
0x109b   :  { %2649 = vsyncpa [#allocation20], 1 }
0x109c   :  { %2650 = vsyncpa [#allocation6], 1 }
0x109d   :  { %2652 = vsyncpa [#allocation6 + $0x1], 1 }

</bundles_post_ra>
